<compile_context>
chip_gen: v5e
topology: v5e:2x2
jax: 0.10.0
libtpu: 0.0.40
codegen_flags: <defaults>
</compile_context>

<pallas_src>
import functools

import jax
import jax.numpy as jnp
from jax.experimental import pallas as pl
from jax.experimental.pallas import tpu as pltpu

EPS = 1e-5


def _round_up(n, m):
    return (n + m - 1) // m * m


def _segments(c0, c0_pad, g, g_pad, n_layers_done):
    """(row in padded slab, row in dense tensor, length) of each real channel segment."""
    segs = [(0, 0, c0)]
    off_p, off_d = c0_pad, c0
    for _ in range(n_layers_done):
        segs.append((off_p, off_d, g))
        off_p += g_pad
        off_d += g
    return segs


def _dense_block_kernel(x_ref, mlane_ref, mprev_ref, mnext_ref, *refs,
                        n_layers, c0_pad, g_pad, inv_n, lane_pad):
    # refs = per-layer [g1, b1, w1, g2, b2, w2_tap0, w2_tap1, w2_tap2] * n_layers, then out_ref.
    out_ref = refs[-1]
    layer_refs = refs[:-1]
    mlane = mlane_ref[...]                       # (1, BLp): 1.0 on real lanes, else 0
    mprev = mprev_ref[...]                       # zero at per-batch first column (and padding)
    mnext = mnext_ref[...]                       # zero at per-batch last column (and padding)

    # Dense "concat": input channels are written once; each layer appends its Gp rows below.
    out_ref[0:c0_pad, :] = x_ref[...]

    offset = c0_pad
    for i in range(n_layers):                    # static unroll; shapes differ per layer
        g1, b1, w1, g2, b2, w2a, w2b, w2c = layer_refs[8 * i: 8 * i + 8]
        c_in_pad = offset
        x = out_ref[0:c_in_pad, :]               # current slab (VMEM resident), static slice

        # --- BatchNorm1d(in), training-mode batch stats (two-pass, lane-masked) + ReLU ---
        m1 = jnp.sum(x, axis=1, keepdims=True) * inv_n
        d1 = (x - m1) * mlane
        v1 = jnp.sum(d1 * d1, axis=1, keepdims=True) * inv_n
        scale1 = g1[...] * jax.lax.rsqrt(v1 + EPS)
        y = jnp.maximum(d1 * scale1 + b1[...], 0.0) * mlane   # re-zero padded lanes

        # --- Conv1d(in -> hidden, k=1, bias=False): channel matmul on the MXU ---
        h = jnp.dot(w1[...], y.astype(w1.dtype), preferred_element_type=jnp.float32)

        # --- BatchNorm1d(hidden) + ReLU (padded rows of w1 are zero -> h padded rows zero) ---
        m2 = jnp.sum(h, axis=1, keepdims=True) * inv_n
        d2 = (h - m2) * mlane
        v2 = jnp.sum(d2 * d2, axis=1, keepdims=True) * inv_n
        scale2 = g2[...] * jax.lax.rsqrt(v2 + EPS)
        z = jnp.maximum(d2 * scale2 + b2[...], 0.0)

        # --- Conv1d(hidden -> growth, k=3, pad=1, bias=False) ---
        # Length shifts are XLU lane rotations with per-batch boundary masks (no shift matrices);
        # the three taps are three accumulating MXU dots (no 3*Hp concat temporary).
        z_prev = pltpu.roll(z, shift=1, axis=1) * mprev              # col j <- z[:, j-1]
        z_next = pltpu.roll(z, shift=lane_pad - 1, axis=1) * mnext   # col j <- z[:, j+1]
        md = w2a.dtype
        out_i = jnp.dot(w2b[...], z.astype(md), preferred_element_type=jnp.float32)
        out_i = out_i + jnp.dot(w2a[...], z_prev.astype(md), preferred_element_type=jnp.float32)
        out_i = out_i + jnp.dot(w2c[...], z_next.astype(md), preferred_element_type=jnp.float32)

        # Append the new (lane-masked) growth rows; prior channels are never re-written.
        out_ref[offset:offset + g_pad, :] = out_i * mlane
        offset += g_pad


def prepare_dense_block_params(layer_params, c0, mm_dtype=jnp.bfloat16):
    """Pad/scatter parameters into the padded-slab layout ONCE (hoisted off the forward path)."""
    H = layer_params[0][2].shape[0]
    G = layer_params[0][5].shape[0]
    c0_pad = _round_up(c0, 8)       # f32 sublane granularity
    g_pad = _round_up(G, 8)
    h_pad = _round_up(H, 16)        # bf16 sublane granularity for the hidden activations
    flat = []
    for i, (g1, b1, w1, g2, b2, w2) in enumerate(layer_params):
        segs = _segments(c0, c0_pad, G, g_pad, i)
        c_in_pad = c0_pad + i * g_pad
        g1p = jnp.zeros((c_in_pad, 1), jnp.float32)
        b1p = jnp.zeros((c_in_pad, 1), jnp.float32)
        w1p = jnp.zeros((h_pad, c_in_pad), jnp.float32)
        for ps, ds, ln in segs:                          # static slices only
            g1p = g1p.at[ps:ps + ln, 0].set(g1[ds:ds + ln])
            b1p = b1p.at[ps:ps + ln, 0].set(b1[ds:ds + ln])
            w1p = w1p.at[:H, ps:ps + ln].set(w1[:, ds:ds + ln])
        g2p = jnp.zeros((h_pad, 1), jnp.float32).at[:H, 0].set(g2)
        b2p = jnp.zeros((h_pad, 1), jnp.float32).at[:H, 0].set(b2)
        w2a = jnp.zeros((g_pad, h_pad), jnp.float32).at[:G, :H].set(w2[:, :, 0])
        w2b = jnp.zeros((g_pad, h_pad), jnp.float32).at[:G, :H].set(w2[:, :, 1])
        w2c = jnp.zeros((g_pad, h_pad), jnp.float32).at[:G, :H].set(w2[:, :, 2])
        flat.extend([g1p, b1p, w1p.astype(mm_dtype), g2p, b2p,
                     w2a.astype(mm_dtype), w2b.astype(mm_dtype), w2c.astype(mm_dtype)])
    meta = dict(c0=c0, c0_pad=c0_pad, g=G, g_pad=g_pad, h=H, h_pad=h_pad,
                n_layers=len(layer_params))
    return flat, meta


def dense_block_pallas(x_ncl, flat_params, meta):
    """DenseBlock forward. x_ncl: (B, C0, L) -> (B, C0 + n*growth, L)."""
    B, C0, L = x_ncl.shape
    assert C0 == meta["c0"]
    BL = B * L
    BLp = _round_up(BL, 128)
    c0_pad, g_pad, h_pad = meta["c0_pad"], meta["g_pad"], meta["h_pad"]
    n_layers, G = meta["n_layers"], meta["g"]
    c_final_pad = c0_pad + n_layers * g_pad

    # Entry glue: NCL -> zero-padded (C, B*L) slab (channels on sublanes, batch*length on lanes).
    x2 = jnp.transpose(x_ncl, (1, 0, 2)).reshape(C0, BL).astype(jnp.float32)
    slab = jnp.zeros((c0_pad, BLp), jnp.float32).at[:C0, :BL].set(x2)

    # Lane masks: valid lanes, and per-batch boundary masks for the k=3 conv shifts.
    pos = jnp.arange(BLp)
    valid = pos < BL
    mlane = valid.astype(jnp.float32).reshape(1, BLp)
    mprev = (valid & (pos % L != 0)).astype(jnp.float32).reshape(1, BLp)
    mnext = (valid & (pos % L != (L - 1))).astype(jnp.float32).reshape(1, BLp)

    kernel = functools.partial(_dense_block_kernel, n_layers=n_layers, c0_pad=c0_pad,
                               g_pad=g_pad, inv_n=1.0 / BL, lane_pad=BLp)

    # VMEM budget: final slab + input slab + masks + per-layer live temporaries + params.
    est = 4 * BLp * (3 * c_final_pad + 8 * h_pad + 2 * g_pad + 4)
    for p in flat_params:
        est += int(p.size) * p.dtype.itemsize
    try:
        vmem_cap = int(pltpu.get_tpu_info().vmem_capacity_bytes)
    except Exception:
        vmem_cap = 64 * 2 ** 20          # conservative (v7x) fallback
    vmem_limit = int(min(max(est, 32 * 2 ** 20), int(0.75 * vmem_cap)))
    # TODO(synk): if est exceeds ~0.75*VMEM, switch to the lane-tiled two-phase pipeline.

    vmem = pl.BlockSpec(memory_space=pltpu.MemorySpace.VMEM)
    out_slab = pl.pallas_call(
        kernel,
        out_shape=jax.ShapeDtypeStruct((c_final_pad, BLp), jnp.float32),
        in_specs=[vmem] * (4 + len(flat_params)),
        out_specs=vmem,
        compiler_params=pltpu.CompilerParams(vmem_limit_bytes=vmem_limit),
    )(slab, mlane, mprev, mnext, *flat_params)

    # Exit glue: static per-segment slices (torch.cat order), back to NCL.
    segs = _segments(C0, c0_pad, G, g_pad, n_layers)
    parts = [out_slab[ps:ps + ln, :BL] for ps, _, ln in segs]
    C_final = C0 + n_layers * G
    y2 = jnp.concatenate(parts, axis=0)
    return y2.reshape(C_final, B, L).transpose(1, 0, 2)


# ---------------- pure-JAX reference (for correctness check) ----------------
def _bottleneck_ref(x, params):
    g1, b1, w1, g2, b2, w2 = params
    m1 = x.mean(axis=(0, 2), keepdims=True)
    v1 = ((x - m1) ** 2).mean(axis=(0, 2), keepdims=True)
    y = (x - m1) / jnp.sqrt(v1 + EPS) * g1.reshape(1, -1, 1) + b1.reshape(1, -1, 1)
    y = jnp.maximum(y, 0.0)
    h = jnp.einsum('hc,bcl->bhl', w1, y)
    m2 = h.mean(axis=(0, 2), keepdims=True)
    v2 = ((h - m2) ** 2).mean(axis=(0, 2), keepdims=True)
    z = (h - m2) / jnp.sqrt(v2 + EPS) * g2.reshape(1, -1, 1) + b2.reshape(1, -1, 1)
    z = jnp.maximum(z, 0.0)
    L = z.shape[2]
    zp = jnp.pad(z, ((0, 0), (0, 0), (1, 1)))
    return (jnp.einsum('gh,bhl->bgl', w2[:, :, 0], zp[:, :, 0:L])
            + jnp.einsum('gh,bhl->bgl', w2[:, :, 1], zp[:, :, 1:L + 1])
            + jnp.einsum('gh,bhl->bgl', w2[:, :, 2], zp[:, :, 2:L + 2]))


def dense_block_ref(x, layer_params):
    for params in layer_params:
        out = _bottleneck_ref(x, params)
        x = jnp.concatenate([x, out], axis=1)
    return x


if __name__ == "__main__":
    B, C0, L = 2, 4, 16
    num_bottlenecks, growth_rate, bottleneck_size = 3, 12, 48

    key = jax.random.PRNGKey(0)
    layer_params = []
    c = C0
    for _ in range(num_bottlenecks):
        key, k0, k1, k2, k3, k4, k5 = jax.random.split(key, 7)
        g1 = 1.0 + 0.1 * jax.random.normal(k0, (c,), jnp.float32)
        b1 = 0.1 * jax.random.normal(k1, (c,), jnp.float32)
        w1 = jax.random.normal(k2, (bottleneck_size, c), jnp.float32) / jnp.sqrt(c)
        g2 = 1.0 + 0.1 * jax.random.normal(k3, (bottleneck_size,), jnp.float32)
        b2 = 0.1 * jax.random.normal(k4, (bottleneck_size,), jnp.float32)
        w2 = (jax.random.normal(k5, (growth_rate, bottleneck_size, 3), jnp.float32)
              / jnp.sqrt(3 * bottleneck_size))
        layer_params.append((g1, b1, w1, g2, b2, w2))
        c += growth_rate

    key, kx = jax.random.split(key)
    x = jax.random.normal(kx, (B, C0, L), jnp.float32)

    y_ref = dense_block_ref(x, layer_params)

    # Exact-semantics check with f32 matmul operands.
    p_f32, m_f32 = prepare_dense_block_params(layer_params, C0, mm_dtype=jnp.float32)
    y_f32 = jax.block_until_ready(dense_block_pallas(x, p_f32, m_f32))
    # Performance path: bf16 MXU operands, f32 accumulation (looser tolerance).
    p_bf16, m_bf16 = prepare_dense_block_params(layer_params, C0, mm_dtype=jnp.bfloat16)
    y_bf16 = jax.block_until_ready(dense_block_pallas(x, p_bf16, m_bf16))

    C_final = C0 + num_bottlenecks * growth_rate
    assert y_f32.shape == (B, C_final, L), y_f32.shape
    assert y_bf16.shape == (B, C_final, L), y_bf16.shape
    assert jnp.allclose(y_f32, y_ref, atol=1e-4, rtol=1e-4), "f32 Pallas output mismatch vs reference"
    assert jnp.allclose(y_bf16, y_ref, atol=2e-2, rtol=2e-2), "bf16 Pallas output mismatch vs reference"
    print("KERNEL_OK")
</pallas_src>

<mosaic_0001>
module attributes {stable_mosaic.version = 11 : i64} {
  func.func @_dense_block_kernel(%arg0: memref<8x128xf32, #tpu.memory_space<vmem>>, %arg1: memref<1x128xf32, #tpu.memory_space<vmem>>, %arg2: memref<1x128xf32, #tpu.memory_space<vmem>>, %arg3: memref<1x128xf32, #tpu.memory_space<vmem>>, %arg4: memref<8x1xf32, #tpu.memory_space<vmem>>, %arg5: memref<8x1xf32, #tpu.memory_space<vmem>>, %arg6: memref<48x8xf32, #tpu.memory_space<vmem>>, %arg7: memref<48x1xf32, #tpu.memory_space<vmem>>, %arg8: memref<48x1xf32, #tpu.memory_space<vmem>>, %arg9: memref<16x48xf32, #tpu.memory_space<vmem>>, %arg10: memref<16x48xf32, #tpu.memory_space<vmem>>, %arg11: memref<16x48xf32, #tpu.memory_space<vmem>>, %arg12: memref<24x1xf32, #tpu.memory_space<vmem>>, %arg13: memref<24x1xf32, #tpu.memory_space<vmem>>, %arg14: memref<48x24xf32, #tpu.memory_space<vmem>>, %arg15: memref<48x1xf32, #tpu.memory_space<vmem>>, %arg16: memref<48x1xf32, #tpu.memory_space<vmem>>, %arg17: memref<16x48xf32, #tpu.memory_space<vmem>>, %arg18: memref<16x48xf32, #tpu.memory_space<vmem>>, %arg19: memref<16x48xf32, #tpu.memory_space<vmem>>, %arg20: memref<40x1xf32, #tpu.memory_space<vmem>>, %arg21: memref<40x1xf32, #tpu.memory_space<vmem>>, %arg22: memref<48x40xf32, #tpu.memory_space<vmem>>, %arg23: memref<48x1xf32, #tpu.memory_space<vmem>>, %arg24: memref<48x1xf32, #tpu.memory_space<vmem>>, %arg25: memref<16x48xf32, #tpu.memory_space<vmem>>, %arg26: memref<16x48xf32, #tpu.memory_space<vmem>>, %arg27: memref<16x48xf32, #tpu.memory_space<vmem>>, %arg28: memref<56x128xf32, #tpu.memory_space<vmem>>) attributes {dimension_semantics = [], scalar_prefetch = 0 : i64, scratch_operands = 0 : i64, tpu.core_type = #tpu.core_type<tc>} {
    %c0 = arith.constant 0 : index
    %c0_0 = arith.constant 0 : index
    %0 = vector.load %arg1[%c0, %c0_0] : memref<1x128xf32, #tpu.memory_space<vmem>>, vector<1x128xf32>
    %c0_1 = arith.constant 0 : index
    %c0_2 = arith.constant 0 : index
    %1 = vector.load %arg2[%c0_1, %c0_2] : memref<1x128xf32, #tpu.memory_space<vmem>>, vector<1x128xf32>
    %c0_3 = arith.constant 0 : index
    %c0_4 = arith.constant 0 : index
    %2 = vector.load %arg3[%c0_3, %c0_4] : memref<1x128xf32, #tpu.memory_space<vmem>>, vector<1x128xf32>
    %c0_5 = arith.constant 0 : index
    %c0_6 = arith.constant 0 : index
    %3 = vector.load %arg0[%c0_5, %c0_6] : memref<8x128xf32, #tpu.memory_space<vmem>>, vector<8x128xf32>
    %c0_7 = arith.constant 0 : index
    %c0_8 = arith.constant 0 : index
    %4 = vector.load %arg28[%c0_7, %c0_8] : memref<56x128xf32, #tpu.memory_space<vmem>>, vector<8x128xf32>
    tpu.vector_store %arg28[%c0_7, %c0_8], %3 {strides = array<i32>} : memref<56x128xf32, #tpu.memory_space<vmem>>, vector<8x128xf32>,
    %c0_9 = arith.constant 0 : index
    %c0_10 = arith.constant 0 : index
    %5 = vector.load %arg28[%c0_9, %c0_10] : memref<56x128xf32, #tpu.memory_space<vmem>>, vector<8x128xf32>
    %cst = arith.constant dense<0.000000e+00> : vector<8xf32>
    %6 = vector.multi_reduction <add>, %5, %cst [1] : vector<8x128xf32> to vector<8xf32>
    %7 = vector.shape_cast %6 : vector<8xf32> to vector<8x1xf32>
    %cst_11 = arith.constant 3.125000e-02 : f32
    %8 = vector.broadcast %cst_11 : f32 to vector<8x1xf32>
    %9 = arith.mulf %7, %8 : vector<8x1xf32>
    %10 = vector.broadcast %9 : vector<8x1xf32> to vector<8x128xf32>
    %11 = arith.subf %5, %10 : vector<8x128xf32>
    %12 = vector.broadcast %0 : vector<1x128xf32> to vector<8x128xf32>
    %13 = arith.mulf %11, %12 : vector<8x128xf32>
    %14 = arith.mulf %13, %13 : vector<8x128xf32>
    %cst_12 = arith.constant dense<0.000000e+00> : vector<8xf32>
    %15 = vector.multi_reduction <add>, %14, %cst_12 [1] : vector<8x128xf32> to vector<8xf32>
    %16 = vector.shape_cast %15 : vector<8xf32> to vector<8x1xf32>
    %cst_13 = arith.constant 3.125000e-02 : f32
    %17 = vector.broadcast %cst_13 : f32 to vector<8x1xf32>
    %18 = arith.mulf %16, %17 : vector<8x1xf32>
    %c0_14 = arith.constant 0 : index
    %c0_15 = arith.constant 0 : index
    %19 = vector.load %arg4[%c0_14, %c0_15] : memref<8x1xf32, #tpu.memory_space<vmem>>, vector<8x1xf32>
    %cst_16 = arith.constant 9.99999974E-6 : f32
    %20 = vector.broadcast %cst_16 : f32 to vector<8x1xf32>
    %21 = arith.addf %18, %20 : vector<8x1xf32>
    %22 = math.rsqrt %21 : vector<8x1xf32>
    %23 = arith.mulf %19, %22 : vector<8x1xf32>
    %24 = vector.broadcast %23 : vector<8x1xf32> to vector<8x128xf32>
    %25 = arith.mulf %13, %24 : vector<8x128xf32>
    %c0_17 = arith.constant 0 : index
    %c0_18 = arith.constant 0 : index
    %26 = vector.load %arg5[%c0_17, %c0_18] : memref<8x1xf32, #tpu.memory_space<vmem>>, vector<8x1xf32>
    %27 = vector.broadcast %26 : vector<8x1xf32> to vector<8x128xf32>
    %28 = arith.addf %25, %27 : vector<8x128xf32>
    %cst_19 = arith.constant 0.000000e+00 : f32
    %29 = vector.broadcast %cst_19 : f32 to vector<8x128xf32>
    %30 = arith.maximumf %28, %29 : vector<8x128xf32>
    %31 = vector.broadcast %0 : vector<1x128xf32> to vector<8x128xf32>
    %32 = arith.mulf %30, %31 : vector<8x128xf32>
    %c0_20 = arith.constant 0 : index
    %c0_21 = arith.constant 0 : index
    %33 = vector.load %arg6[%c0_20, %c0_21] : memref<48x8xf32, #tpu.memory_space<vmem>>, vector<48x8xf32>
    %cst_22 = arith.constant dense<0.000000e+00> : vector<48x128xf32>
    %34 = tpu.matmul %33, %32, %cst_22 {dimension_numbers = #tpu.dot_dimension_numbers<[1], [0], [0], [1], [0, 0, 1, 1], [], []>} : vector<48x8xf32>, vector<8x128xf32>, vector<48x128xf32> -> vector<48x128xf32>
    %cst_23 = arith.constant dense<0.000000e+00> : vector<48xf32>
    %35 = vector.multi_reduction <add>, %34, %cst_23 [1] : vector<48x128xf32> to vector<48xf32>
    %36 = vector.shape_cast %35 : vector<48xf32> to vector<48x1xf32>
    %cst_24 = arith.constant 3.125000e-02 : f32
    %37 = vector.broadcast %cst_24 : f32 to vector<48x1xf32>
    %38 = arith.mulf %36, %37 : vector<48x1xf32>
    %39 = vector.broadcast %38 : vector<48x1xf32> to vector<48x128xf32>
    %40 = arith.subf %34, %39 : vector<48x128xf32>
    %41 = vector.broadcast %0 : vector<1x128xf32> to vector<48x128xf32>
    %42 = arith.mulf %40, %41 : vector<48x128xf32>
    %43 = arith.mulf %42, %42 : vector<48x128xf32>
    %cst_25 = arith.constant dense<0.000000e+00> : vector<48xf32>
    %44 = vector.multi_reduction <add>, %43, %cst_25 [1] : vector<48x128xf32> to vector<48xf32>
    %45 = vector.shape_cast %44 : vector<48xf32> to vector<48x1xf32>
    %cst_26 = arith.constant 3.125000e-02 : f32
    %46 = vector.broadcast %cst_26 : f32 to vector<48x1xf32>
    %47 = arith.mulf %45, %46 : vector<48x1xf32>
    %c0_27 = arith.constant 0 : index
    %c0_28 = arith.constant 0 : index
    %48 = vector.load %arg7[%c0_27, %c0_28] : memref<48x1xf32, #tpu.memory_space<vmem>>, vector<48x1xf32>
    %cst_29 = arith.constant 9.99999974E-6 : f32
    %49 = vector.broadcast %cst_29 : f32 to vector<48x1xf32>
    %50 = arith.addf %47, %49 : vector<48x1xf32>
    %51 = math.rsqrt %50 : vector<48x1xf32>
    %52 = arith.mulf %48, %51 : vector<48x1xf32>
    %53 = vector.broadcast %52 : vector<48x1xf32> to vector<48x128xf32>
    %54 = arith.mulf %42, %53 : vector<48x128xf32>
    %c0_30 = arith.constant 0 : index
    %c0_31 = arith.constant 0 : index
    %55 = vector.load %arg8[%c0_30, %c0_31] : memref<48x1xf32, #tpu.memory_space<vmem>>, vector<48x1xf32>
    %56 = vector.broadcast %55 : vector<48x1xf32> to vector<48x128xf32>
    %57 = arith.addf %54, %56 : vector<48x128xf32>
    %cst_32 = arith.constant 0.000000e+00 : f32
    %58 = vector.broadcast %cst_32 : f32 to vector<48x128xf32>
    %59 = arith.maximumf %57, %58 : vector<48x128xf32>
    %c1_i32 = arith.constant 1 : i32
    %60 = tpu.dynamic_rotate %59 by %c1_i32 dim 1 : vector<48x128xf32>, i32 -> vector<48x128xf32>
    %61 = vector.broadcast %1 : vector<1x128xf32> to vector<48x128xf32>
    %62 = arith.mulf %60, %61 : vector<48x128xf32>
    %c127_i32 = arith.constant 127 : i32
    %63 = tpu.dynamic_rotate %59 by %c127_i32 dim 1 : vector<48x128xf32>, i32 -> vector<48x128xf32>
    %64 = vector.broadcast %2 : vector<1x128xf32> to vector<48x128xf32>
    %65 = arith.mulf %63, %64 : vector<48x128xf32>
    %c0_33 = arith.constant 0 : index
    %c0_34 = arith.constant 0 : index
    %66 = vector.load %arg10[%c0_33, %c0_34] : memref<16x48xf32, #tpu.memory_space<vmem>>, vector<16x48xf32>
    %cst_35 = arith.constant dense<0.000000e+00> : vector<16x128xf32>
    %67 = tpu.matmul %66, %59, %cst_35 {dimension_numbers = #tpu.dot_dimension_numbers<[1], [0], [0], [1], [0, 0, 1, 1], [], []>} : vector<16x48xf32>, vector<48x128xf32>, vector<16x128xf32> -> vector<16x128xf32>
    %c0_36 = arith.constant 0 : index
    %c0_37 = arith.constant 0 : index
    %68 = vector.load %arg9[%c0_36, %c0_37] : memref<16x48xf32, #tpu.memory_space<vmem>>, vector<16x48xf32>
    %cst_38 = arith.constant dense<0.000000e+00> : vector<16x128xf32>
    %69 = tpu.matmul %68, %62, %cst_38 {dimension_numbers = #tpu.dot_dimension_numbers<[1], [0], [0], [1], [0, 0, 1, 1], [], []>} : vector<16x48xf32>, vector<48x128xf32>, vector<16x128xf32> -> vector<16x128xf32>
    %70 = arith.addf %67, %69 : vector<16x128xf32>
    %c0_39 = arith.constant 0 : index
    %c0_40 = arith.constant 0 : index
    %71 = vector.load %arg11[%c0_39, %c0_40] : memref<16x48xf32, #tpu.memory_space<vmem>>, vector<16x48xf32>
    %cst_41 = arith.constant dense<0.000000e+00> : vector<16x128xf32>
    %72 = tpu.matmul %71, %65, %cst_41 {dimension_numbers = #tpu.dot_dimension_numbers<[1], [0], [0], [1], [0, 0, 1, 1], [], []>} : vector<16x48xf32>, vector<48x128xf32>, vector<16x128xf32> -> vector<16x128xf32>
    %73 = arith.addf %70, %72 : vector<16x128xf32>
    %74 = vector.broadcast %0 : vector<1x128xf32> to vector<16x128xf32>
    %75 = arith.mulf %73, %74 : vector<16x128xf32>
    %c8 = arith.constant 8 : index
    %c0_42 = arith.constant 0 : index
    %76 = vector.load %arg28[%c8, %c0_42] : memref<56x128xf32, #tpu.memory_space<vmem>>, vector<16x128xf32>
    tpu.vector_store %arg28[%c8, %c0_42], %75 {strides = array<i32>} : memref<56x128xf32, #tpu.memory_space<vmem>>, vector<16x128xf32>,
    %c0_43 = arith.constant 0 : index
    %c0_44 = arith.constant 0 : index
    %77 = vector.load %arg28[%c0_43, %c0_44] : memref<56x128xf32, #tpu.memory_space<vmem>>, vector<24x128xf32>
    %cst_45 = arith.constant dense<0.000000e+00> : vector<24xf32>
    %78 = vector.multi_reduction <add>, %77, %cst_45 [1] : vector<24x128xf32> to vector<24xf32>
    %79 = vector.shape_cast %78 : vector<24xf32> to vector<24x1xf32>
    %cst_46 = arith.constant 3.125000e-02 : f32
    %80 = vector.broadcast %cst_46 : f32 to vector<24x1xf32>
    %81 = arith.mulf %79, %80 : vector<24x1xf32>
    %82 = vector.broadcast %81 : vector<24x1xf32> to vector<24x128xf32>
    %83 = arith.subf %77, %82 : vector<24x128xf32>
    %84 = vector.broadcast %0 : vector<1x128xf32> to vector<24x128xf32>
    %85 = arith.mulf %83, %84 : vector<24x128xf32>
    %86 = arith.mulf %85, %85 : vector<24x128xf32>
    %cst_47 = arith.constant dense<0.000000e+00> : vector<24xf32>
    %87 = vector.multi_reduction <add>, %86, %cst_47 [1] : vector<24x128xf32> to vector<24xf32>
    %88 = vector.shape_cast %87 : vector<24xf32> to vector<24x1xf32>
    %cst_48 = arith.constant 3.125000e-02 : f32
    %89 = vector.broadcast %cst_48 : f32 to vector<24x1xf32>
    %90 = arith.mulf %88, %89 : vector<24x1xf32>
    %c0_49 = arith.constant 0 : index
    %c0_50 = arith.constant 0 : index
    %91 = vector.load %arg12[%c0_49, %c0_50] : memref<24x1xf32, #tpu.memory_space<vmem>>, vector<24x1xf32>
    %cst_51 = arith.constant 9.99999974E-6 : f32
    %92 = vector.broadcast %cst_51 : f32 to vector<24x1xf32>
    %93 = arith.addf %90, %92 : vector<24x1xf32>
    %94 = math.rsqrt %93 : vector<24x1xf32>
    %95 = arith.mulf %91, %94 : vector<24x1xf32>
    %96 = vector.broadcast %95 : vector<24x1xf32> to vector<24x128xf32>
    %97 = arith.mulf %85, %96 : vector<24x128xf32>
    %c0_52 = arith.constant 0 : index
    %c0_53 = arith.constant 0 : index
    %98 = vector.load %arg13[%c0_52, %c0_53] : memref<24x1xf32, #tpu.memory_space<vmem>>, vector<24x1xf32>
    %99 = vector.broadcast %98 : vector<24x1xf32> to vector<24x128xf32>
    %100 = arith.addf %97, %99 : vector<24x128xf32>
    %cst_54 = arith.constant 0.000000e+00 : f32
    %101 = vector.broadcast %cst_54 : f32 to vector<24x128xf32>
    %102 = arith.maximumf %100, %101 : vector<24x128xf32>
    %103 = vector.broadcast %0 : vector<1x128xf32> to vector<24x128xf32>
    %104 = arith.mulf %102, %103 : vector<24x128xf32>
    %c0_55 = arith.constant 0 : index
    %c0_56 = arith.constant 0 : index
    %105 = vector.load %arg14[%c0_55, %c0_56] : memref<48x24xf32, #tpu.memory_space<vmem>>, vector<48x24xf32>
    %cst_57 = arith.constant dense<0.000000e+00> : vector<48x128xf32>
    %106 = tpu.matmul %105, %104, %cst_57 {dimension_numbers = #tpu.dot_dimension_numbers<[1], [0], [0], [1], [0, 0, 1, 1], [], []>} : vector<48x24xf32>, vector<24x128xf32>, vector<48x128xf32> -> vector<48x128xf32>
    %cst_58 = arith.constant dense<0.000000e+00> : vector<48xf32>
    %107 = vector.multi_reduction <add>, %106, %cst_58 [1] : vector<48x128xf32> to vector<48xf32>
    %108 = vector.shape_cast %107 : vector<48xf32> to vector<48x1xf32>
    %cst_59 = arith.constant 3.125000e-02 : f32
    %109 = vector.broadcast %cst_59 : f32 to vector<48x1xf32>
    %110 = arith.mulf %108, %109 : vector<48x1xf32>
    %111 = vector.broadcast %110 : vector<48x1xf32> to vector<48x128xf32>
    %112 = arith.subf %106, %111 : vector<48x128xf32>
    %113 = vector.broadcast %0 : vector<1x128xf32> to vector<48x128xf32>
    %114 = arith.mulf %112, %113 : vector<48x128xf32>
    %115 = arith.mulf %114, %114 : vector<48x128xf32>
    %cst_60 = arith.constant dense<0.000000e+00> : vector<48xf32>
    %116 = vector.multi_reduction <add>, %115, %cst_60 [1] : vector<48x128xf32> to vector<48xf32>
    %117 = vector.shape_cast %116 : vector<48xf32> to vector<48x1xf32>
    %cst_61 = arith.constant 3.125000e-02 : f32
    %118 = vector.broadcast %cst_61 : f32 to vector<48x1xf32>
    %119 = arith.mulf %117, %118 : vector<48x1xf32>
    %c0_62 = arith.constant 0 : index
    %c0_63 = arith.constant 0 : index
    %120 = vector.load %arg15[%c0_62, %c0_63] : memref<48x1xf32, #tpu.memory_space<vmem>>, vector<48x1xf32>
    %cst_64 = arith.constant 9.99999974E-6 : f32
    %121 = vector.broadcast %cst_64 : f32 to vector<48x1xf32>
    %122 = arith.addf %119, %121 : vector<48x1xf32>
    %123 = math.rsqrt %122 : vector<48x1xf32>
    %124 = arith.mulf %120, %123 : vector<48x1xf32>
    %125 = vector.broadcast %124 : vector<48x1xf32> to vector<48x128xf32>
    %126 = arith.mulf %114, %125 : vector<48x128xf32>
    %c0_65 = arith.constant 0 : index
    %c0_66 = arith.constant 0 : index
    %127 = vector.load %arg16[%c0_65, %c0_66] : memref<48x1xf32, #tpu.memory_space<vmem>>, vector<48x1xf32>
    %128 = vector.broadcast %127 : vector<48x1xf32> to vector<48x128xf32>
    %129 = arith.addf %126, %128 : vector<48x128xf32>
    %cst_67 = arith.constant 0.000000e+00 : f32
    %130 = vector.broadcast %cst_67 : f32 to vector<48x128xf32>
    %131 = arith.maximumf %129, %130 : vector<48x128xf32>
    %c1_i32_68 = arith.constant 1 : i32
    %132 = tpu.dynamic_rotate %131 by %c1_i32_68 dim 1 : vector<48x128xf32>, i32 -> vector<48x128xf32>
    %133 = vector.broadcast %1 : vector<1x128xf32> to vector<48x128xf32>
    %134 = arith.mulf %132, %133 : vector<48x128xf32>
    %c127_i32_69 = arith.constant 127 : i32
    %135 = tpu.dynamic_rotate %131 by %c127_i32_69 dim 1 : vector<48x128xf32>, i32 -> vector<48x128xf32>
    %136 = vector.broadcast %2 : vector<1x128xf32> to vector<48x128xf32>
    %137 = arith.mulf %135, %136 : vector<48x128xf32>
    %c0_70 = arith.constant 0 : index
    %c0_71 = arith.constant 0 : index
    %138 = vector.load %arg18[%c0_70, %c0_71] : memref<16x48xf32, #tpu.memory_space<vmem>>, vector<16x48xf32>
    %cst_72 = arith.constant dense<0.000000e+00> : vector<16x128xf32>
    %139 = tpu.matmul %138, %131, %cst_72 {dimension_numbers = #tpu.dot_dimension_numbers<[1], [0], [0], [1], [0, 0, 1, 1], [], []>} : vector<16x48xf32>, vector<48x128xf32>, vector<16x128xf32> -> vector<16x128xf32>
    %c0_73 = arith.constant 0 : index
    %c0_74 = arith.constant 0 : index
    %140 = vector.load %arg17[%c0_73, %c0_74] : memref<16x48xf32, #tpu.memory_space<vmem>>, vector<16x48xf32>
    %cst_75 = arith.constant dense<0.000000e+00> : vector<16x128xf32>
    %141 = tpu.matmul %140, %134, %cst_75 {dimension_numbers = #tpu.dot_dimension_numbers<[1], [0], [0], [1], [0, 0, 1, 1], [], []>} : vector<16x48xf32>, vector<48x128xf32>, vector<16x128xf32> -> vector<16x128xf32>
    %142 = arith.addf %139, %141 : vector<16x128xf32>
    %c0_76 = arith.constant 0 : index
    %c0_77 = arith.constant 0 : index
    %143 = vector.load %arg19[%c0_76, %c0_77] : memref<16x48xf32, #tpu.memory_space<vmem>>, vector<16x48xf32>
    %cst_78 = arith.constant dense<0.000000e+00> : vector<16x128xf32>
    %144 = tpu.matmul %143, %137, %cst_78 {dimension_numbers = #tpu.dot_dimension_numbers<[1], [0], [0], [1], [0, 0, 1, 1], [], []>} : vector<16x48xf32>, vector<48x128xf32>, vector<16x128xf32> -> vector<16x128xf32>
    %145 = arith.addf %142, %144 : vector<16x128xf32>
    %146 = vector.broadcast %0 : vector<1x128xf32> to vector<16x128xf32>
    %147 = arith.mulf %145, %146 : vector<16x128xf32>
    %c24 = arith.constant 24 : index
    %c0_79 = arith.constant 0 : index
    %148 = vector.load %arg28[%c24, %c0_79] : memref<56x128xf32, #tpu.memory_space<vmem>>, vector<16x128xf32>
    tpu.vector_store %arg28[%c24, %c0_79], %147 {strides = array<i32>} : memref<56x128xf32, #tpu.memory_space<vmem>>, vector<16x128xf32>,
    %c0_80 = arith.constant 0 : index
    %c0_81 = arith.constant 0 : index
    %149 = vector.load %arg28[%c0_80, %c0_81] : memref<56x128xf32, #tpu.memory_space<vmem>>, vector<40x128xf32>
    %cst_82 = arith.constant dense<0.000000e+00> : vector<40xf32>
    %150 = vector.multi_reduction <add>, %149, %cst_82 [1] : vector<40x128xf32> to vector<40xf32>
    %151 = vector.shape_cast %150 : vector<40xf32> to vector<40x1xf32>
    %cst_83 = arith.constant 3.125000e-02 : f32
    %152 = vector.broadcast %cst_83 : f32 to vector<40x1xf32>
    %153 = arith.mulf %151, %152 : vector<40x1xf32>
    %154 = vector.broadcast %153 : vector<40x1xf32> to vector<40x128xf32>
    %155 = arith.subf %149, %154 : vector<40x128xf32>
    %156 = vector.broadcast %0 : vector<1x128xf32> to vector<40x128xf32>
    %157 = arith.mulf %155, %156 : vector<40x128xf32>
    %158 = arith.mulf %157, %157 : vector<40x128xf32>
    %cst_84 = arith.constant dense<0.000000e+00> : vector<40xf32>
    %159 = vector.multi_reduction <add>, %158, %cst_84 [1] : vector<40x128xf32> to vector<40xf32>
    %160 = vector.shape_cast %159 : vector<40xf32> to vector<40x1xf32>
    %cst_85 = arith.constant 3.125000e-02 : f32
    %161 = vector.broadcast %cst_85 : f32 to vector<40x1xf32>
    %162 = arith.mulf %160, %161 : vector<40x1xf32>
    %c0_86 = arith.constant 0 : index
    %c0_87 = arith.constant 0 : index
    %163 = vector.load %arg20[%c0_86, %c0_87] : memref<40x1xf32, #tpu.memory_space<vmem>>, vector<40x1xf32>
    %cst_88 = arith.constant 9.99999974E-6 : f32
    %164 = vector.broadcast %cst_88 : f32 to vector<40x1xf32>
    %165 = arith.addf %162, %164 : vector<40x1xf32>
    %166 = math.rsqrt %165 : vector<40x1xf32>
    %167 = arith.mulf %163, %166 : vector<40x1xf32>
    %168 = vector.broadcast %167 : vector<40x1xf32> to vector<40x128xf32>
    %169 = arith.mulf %157, %168 : vector<40x128xf32>
    %c0_89 = arith.constant 0 : index
    %c0_90 = arith.constant 0 : index
    %170 = vector.load %arg21[%c0_89, %c0_90] : memref<40x1xf32, #tpu.memory_space<vmem>>, vector<40x1xf32>
    %171 = vector.broadcast %170 : vector<40x1xf32> to vector<40x128xf32>
    %172 = arith.addf %169, %171 : vector<40x128xf32>
    %cst_91 = arith.constant 0.000000e+00 : f32
    %173 = vector.broadcast %cst_91 : f32 to vector<40x128xf32>
    %174 = arith.maximumf %172, %173 : vector<40x128xf32>
    %175 = vector.broadcast %0 : vector<1x128xf32> to vector<40x128xf32>
    %176 = arith.mulf %174, %175 : vector<40x128xf32>
    %c0_92 = arith.constant 0 : index
    %c0_93 = arith.constant 0 : index
    %177 = vector.load %arg22[%c0_92, %c0_93] : memref<48x40xf32, #tpu.memory_space<vmem>>, vector<48x40xf32>
    %cst_94 = arith.constant dense<0.000000e+00> : vector<48x128xf32>
    %178 = tpu.matmul %177, %176, %cst_94 {dimension_numbers = #tpu.dot_dimension_numbers<[1], [0], [0], [1], [0, 0, 1, 1], [], []>} : vector<48x40xf32>, vector<40x128xf32>, vector<48x128xf32> -> vector<48x128xf32>
    %cst_95 = arith.constant dense<0.000000e+00> : vector<48xf32>
    %179 = vector.multi_reduction <add>, %178, %cst_95 [1] : vector<48x128xf32> to vector<48xf32>
    %180 = vector.shape_cast %179 : vector<48xf32> to vector<48x1xf32>
    %cst_96 = arith.constant 3.125000e-02 : f32
    %181 = vector.broadcast %cst_96 : f32 to vector<48x1xf32>
    %182 = arith.mulf %180, %181 : vector<48x1xf32>
    %183 = vector.broadcast %182 : vector<48x1xf32> to vector<48x128xf32>
    %184 = arith.subf %178, %183 : vector<48x128xf32>
    %185 = vector.broadcast %0 : vector<1x128xf32> to vector<48x128xf32>
    %186 = arith.mulf %184, %185 : vector<48x128xf32>
    %187 = arith.mulf %186, %186 : vector<48x128xf32>
    %cst_97 = arith.constant dense<0.000000e+00> : vector<48xf32>
    %188 = vector.multi_reduction <add>, %187, %cst_97 [1] : vector<48x128xf32> to vector<48xf32>
    %189 = vector.shape_cast %188 : vector<48xf32> to vector<48x1xf32>
    %cst_98 = arith.constant 3.125000e-02 : f32
    %190 = vector.broadcast %cst_98 : f32 to vector<48x1xf32>
    %191 = arith.mulf %189, %190 : vector<48x1xf32>
    %c0_99 = arith.constant 0 : index
    %c0_100 = arith.constant 0 : index
    %192 = vector.load %arg23[%c0_99, %c0_100] : memref<48x1xf32, #tpu.memory_space<vmem>>, vector<48x1xf32>
    %cst_101 = arith.constant 9.99999974E-6 : f32
    %193 = vector.broadcast %cst_101 : f32 to vector<48x1xf32>
    %194 = arith.addf %191, %193 : vector<48x1xf32>
    %195 = math.rsqrt %194 : vector<48x1xf32>
    %196 = arith.mulf %192, %195 : vector<48x1xf32>
    %197 = vector.broadcast %196 : vector<48x1xf32> to vector<48x128xf32>
    %198 = arith.mulf %186, %197 : vector<48x128xf32>
    %c0_102 = arith.constant 0 : index
    %c0_103 = arith.constant 0 : index
    %199 = vector.load %arg24[%c0_102, %c0_103] : memref<48x1xf32, #tpu.memory_space<vmem>>, vector<48x1xf32>
    %200 = vector.broadcast %199 : vector<48x1xf32> to vector<48x128xf32>
    %201 = arith.addf %198, %200 : vector<48x128xf32>
    %cst_104 = arith.constant 0.000000e+00 : f32
    %202 = vector.broadcast %cst_104 : f32 to vector<48x128xf32>
    %203 = arith.maximumf %201, %202 : vector<48x128xf32>
    %c1_i32_105 = arith.constant 1 : i32
    %204 = tpu.dynamic_rotate %203 by %c1_i32_105 dim 1 : vector<48x128xf32>, i32 -> vector<48x128xf32>
    %205 = vector.broadcast %1 : vector<1x128xf32> to vector<48x128xf32>
    %206 = arith.mulf %204, %205 : vector<48x128xf32>
    %c127_i32_106 = arith.constant 127 : i32
    %207 = tpu.dynamic_rotate %203 by %c127_i32_106 dim 1 : vector<48x128xf32>, i32 -> vector<48x128xf32>
    %208 = vector.broadcast %2 : vector<1x128xf32> to vector<48x128xf32>
    %209 = arith.mulf %207, %208 : vector<48x128xf32>
    %c0_107 = arith.constant 0 : index
    %c0_108 = arith.constant 0 : index
    %210 = vector.load %arg26[%c0_107, %c0_108] : memref<16x48xf32, #tpu.memory_space<vmem>>, vector<16x48xf32>
    %cst_109 = arith.constant dense<0.000000e+00> : vector<16x128xf32>
    %211 = tpu.matmul %210, %203, %cst_109 {dimension_numbers = #tpu.dot_dimension_numbers<[1], [0], [0], [1], [0, 0, 1, 1], [], []>} : vector<16x48xf32>, vector<48x128xf32>, vector<16x128xf32> -> vector<16x128xf32>
    %c0_110 = arith.constant 0 : index
    %c0_111 = arith.constant 0 : index
    %212 = vector.load %arg25[%c0_110, %c0_111] : memref<16x48xf32, #tpu.memory_space<vmem>>, vector<16x48xf32>
    %cst_112 = arith.constant dense<0.000000e+00> : vector<16x128xf32>
    %213 = tpu.matmul %212, %206, %cst_112 {dimension_numbers = #tpu.dot_dimension_numbers<[1], [0], [0], [1], [0, 0, 1, 1], [], []>} : vector<16x48xf32>, vector<48x128xf32>, vector<16x128xf32> -> vector<16x128xf32>
    %214 = arith.addf %211, %213 : vector<16x128xf32>
    %c0_113 = arith.constant 0 : index
    %c0_114 = arith.constant 0 : index
    %215 = vector.load %arg27[%c0_113, %c0_114] : memref<16x48xf32, #tpu.memory_space<vmem>>, vector<16x48xf32>
    %cst_115 = arith.constant dense<0.000000e+00> : vector<16x128xf32>
    %216 = tpu.matmul %215, %209, %cst_115 {dimension_numbers = #tpu.dot_dimension_numbers<[1], [0], [0], [1], [0, 0, 1, 1], [], []>} : vector<16x48xf32>, vector<48x128xf32>, vector<16x128xf32> -> vector<16x128xf32>
    %217 = arith.addf %214, %216 : vector<16x128xf32>
    %218 = vector.broadcast %0 : vector<1x128xf32> to vector<16x128xf32>
    %219 = arith.mulf %217, %218 : vector<16x128xf32>
    %c40 = arith.constant 40 : index
    %c0_116 = arith.constant 0 : index
    %220 = vector.load %arg28[%c40, %c0_116] : memref<56x128xf32, #tpu.memory_space<vmem>>, vector<16x128xf32>
    tpu.vector_store %arg28[%c40, %c0_116], %219 {strides = array<i32>} : memref<56x128xf32, #tpu.memory_space<vmem>>, vector<16x128xf32>,
    return
  }
}

</mosaic_0001>

<bundles_post_ra>
// kernel: tpu_custom_call.1
= control target key start
LH: loop header
LB: loop body
LE: loop exit
PB: predicated region body
PF: predicated region fallthrough
CT: control target
= control target key end

     0   :  { %s2573_s0 = inlined_call_operand.vmem [shape: f32[8,128], index: 0, kind: input, shape index: {}]   ;;  %s2574_s1 = inlined_call_operand.vmem [shape: f32[1,128], index: 1, kind: input, shape index: {}]   ;;  %s2575_s2 = inlined_call_operand.vmem [shape: f32[1,128], index: 2, kind: input, shape index: {}]   ;;  %s2576_s3 = inlined_call_operand.vmem [shape: f32[1,128], index: 3, kind: input, shape index: {}]   ;;  %s2577_s4 = inlined_call_operand.vmem [shape: f32[8,1], index: 4, kind: input, shape index: {}]   ;;  %s2578_s5 = inlined_call_operand.vmem [shape: f32[8,1], index: 5, kind: input, shape index: {}]   ;;  %s2579_s6 = inlined_call_operand.vmem [shape: f32[48,8], index: 6, kind: input, shape index: {}]   ;;  %s2580_s7 = inlined_call_operand.vmem [shape: f32[48,1], index: 7, kind: input, shape index: {}]   ;;  %s2581_s8 = inlined_call_operand.vmem [shape: f32[48,1], index: 8, kind: input, shape index: {}]   ;;  %s2582_s9 = inlined_call_operand.vmem [shape: f32[16,48], index: 9, kind: input, shape index: {}]   ;;  %s2583_s10 = inlined_call_operand.vmem [shape: f32[16,48], index: 10, kind: input, shape index: {}]   ;;  %s2584_s11 = inlined_call_operand.vmem [shape: f32[16,48], index: 11, kind: input, shape index: {}]   ;;  %s2585_s12 = inlined_call_operand.vmem [shape: f32[24,1], index: 12, kind: input, shape index: {}]   ;;  %s2586_s13 = inlined_call_operand.vmem [shape: f32[24,1], index: 13, kind: input, shape index: {}]   ;;  %s2587_s14 = inlined_call_operand.vmem [shape: f32[48,24], index: 14, kind: input, shape index: {}]   ;;  %s2588_s15 = inlined_call_operand.vmem [shape: f32[48,1], index: 15, kind: input, shape index: {}]   ;;  %s2589_s16 = inlined_call_operand.vmem [shape: f32[48,1], index: 16, kind: input, shape index: {}]   ;;  %s2590_s17 = inlined_call_operand.vmem [shape: f32[16,48], index: 17, kind: input, shape index: {}]   ;;  %s2591_s18 = inlined_call_operand.vmem [shape: f32[16,48], index: 18, kind: input, shape index: {}]   ;;  %s2592_s19 = inlined_call_operand.vmem [shape: f32[16,48], index: 19, kind: input, shape index: {}]   ;;  %s2593_s20 = inlined_call_operand.vmem [shape: f32[40,1], index: 20, kind: input, shape index: {}]   ;;  %s2594_s21 = inlined_call_operand.vmem [shape: f32[40,1], index: 21, kind: input, shape index: {}]   ;;  %s2595_s22 = inlined_call_operand.vmem [shape: f32[48,40], index: 22, kind: input, shape index: {}]   ;;  %s2596_s23 = inlined_call_operand.vmem [shape: f32[48,1], index: 23, kind: input, shape index: {}]   ;;  %s2597_s24 = inlined_call_operand.vmem [shape: f32[48,1], index: 24, kind: input, shape index: {}]   ;;  %s2598_s25 = inlined_call_operand.vmem [shape: f32[16,48], index: 25, kind: input, shape index: {}]   ;;  %s2599_s26 = inlined_call_operand.vmem [shape: f32[16,48], index: 26, kind: input, shape index: {}]   ;;  %s2600_s27 = inlined_call_operand.vmem [shape: f32[16,48], index: 27, kind: input, shape index: {}]   ;;  %s2601_s28 = inlined_call_operand.hbm [shape: f32[56,128], index: 28, kind: output, shape index: {}]  }
   0x1   :  { %2612 = sst [smem:[#allocation5_spill]] %s2573_s0 }
   0x2   :  { %2613 = sst [smem:[#allocation6_spill]] %s2574_s1 }
   0x3   :  { %2614 = sst [smem:[#allocation7_spill]] %s2575_s2 }
   0x4   :  { %2615 = sst [smem:[#allocation8_spill]] %s2576_s3 }
   0x5   :  { %2616 = sst [smem:[#allocation9_spill]] %s2577_s4 }
   0x6   :  { %2617 = sst [smem:[#allocation10_spill]] %s2578_s5 }
   0x7   :  { %2618 = sst [smem:[#allocation11_spill]] %s2579_s6 }
   0x8   :  { %2619 = sst [smem:[#allocation12_spill]] %s2580_s7 }
   0x9   :  { %2620 = sst [smem:[#allocation13_spill]] %s2581_s8 }
   0xa   :  { %2621 = sst [smem:[#allocation14_spill]] %s2582_s9 }
   0xb   :  { %2622 = sst [smem:[#allocation15_spill]] %s2583_s10 }
   0xc   :  { %2623 = sst [smem:[#allocation16_spill]] %s2584_s11 }
   0xd   :  { %2624 = sst [smem:[#allocation17_spill]] %s2585_s12 }
   0xe   :  { %s2625_s9 = sld [smem:[#allocation5_spill]] }
  0x14   :  { %v1988_v0 = vld [vmem:[%s2625_s9] sm:$0xff] }
  0x15   :  { %94 = vst [vmem:[#allocation2] sm:$0xff] %v1988_v0  ;;  %96 = vadd.xlane.f32.xlu0 %v1988_v0 }
  0x16   :  { %33 = vsyncpa [#allocation3], 0  ;;  %s2626_s6 = sld [smem:[#allocation6_spill]]  ;;  %v1834_v7 = vmov 0   ;;  %vm142_vm3 = vcmask 64512   ;;  %s1839_s8 = smov 8  }
  0x17   :  { %1745 = vset.pattern.permute.xlu1 %v1834_v7  ;;  %1746 = vset.pattern.permute.xlu2 %v1834_v7  ;;  %s2627_s11 = sld [smem:[#allocation9_spill]] }
  0x18   :  { %1747 = vset.pattern.permute.xlu0 %v1834_v7  ;;  %s2628_s7 = sld [smem:[#allocation10_spill]] }
  0x19   :  { %s2629_s4 = sld [smem:[#allocation11_spill]] }
  0x1a   :  { %s2630_s1 = sld [smem:[#allocation13_spill]] }
  0x1b   :  { %s2631_s30 = sld [smem:[#allocation12_spill]] }
  0x1c   :  { %v1995_v3 = vld [vmem:[%s2626_s6] ss:$0 sm:$0xff]  ;;  %s2633_s9 = sld [smem:[#allocation15_spill]] }
  0x1d   :  { %v108_v16 = vld [vmem:[%s2627_s11] sm:$0xff]  ;;  %s2634_s29 = sld [smem:[#allocation7_spill]] }
  0x1e   :  { %v127_v20 = vld [vmem:[%s2628_s7] sm:$0xff]  ;;  %s2635_s12 = sld [smem:[#allocation16_spill]] }
  0x1f   :  { %v136_v27 = vld [vmem:[%s2629_s4] sm:$0xff]  ;;  %v137_v28 = vld [vmem:[%s2629_s4 + $0x8] sm:$0xff]  ;;  %v138_v29 = vld [vmem:[%s2629_s4 + $0x10] sm:$0xff]  ;;  %s2637_s5 = sld [smem:[#allocation17_spill]] }
  0x20   :  { %v139_v30 = vld [vmem:[%s2629_s4 + $0x18] sm:$0xff]  ;;  %v140_v31 = vld [vmem:[%s2629_s4 + $0x20] sm:$0xff]  ;;  %v141_v32 = vld [vmem:[%s2629_s4 + $0x28] sm:$0xff]  ;;  %s2632_s4 = sld [smem:[#allocation8_spill]] }
  0x21   :  { %v369_v38 = vld [vmem:[%s2630_s1 + $0x28] sm:$0xff] }
  0x88   :  { %v97_v1 = vpop.xlane.xlu0 %96 }
  0x89   :  { %v98_v2 = vmul.f32 0.03125, %v97_v1 }
  0x8b   :  { %v99_v4 = vsub.f32 %v1988_v0, %v98_v2 }
  0x8d   :  { %v103_v5 = vmul.f32 %v1995_v3, %v99_v4 }
  0x8f   :  { %v104_v6 = vmul.f32 %v103_v5, %v103_v5 }
  0x91   :  { %105 = vadd.xlane.f32.xlu0 %v104_v6 }
 0x104   :  { %v106_v8 = vpop.xlane.xlu0 %105 }
 0x105   :  { %v107_v9 = vmul.f32 0.03125, %v106_v8  ;;  %v368_v8 = vld [vmem:[%s2630_s1 + $0x20] sm:$0xff] }
 0x107   :  { %v109_v10 = vadd.f32 1e-05, %v107_v9 }
 0x109   :  { %1751 = vrsqrt.f32 %v109_v10  ;;  %vm116_vm1 = vweird.f32 %v109_v10 }
 0x10f   :  { %v1752_v11 = vpop.eup %1751 }
 0x110   :  { %v111_v12 = vmul.f32 %v1752_v11, %v109_v10  ;;  %vm117_vm0 = vweird.f32 %v1752_v11 }
 0x111   :  { %vm118_vm2 = vmor %vm116_vm1, %vm117_vm0 }
 0x112   :  { %v112_v13 = vmul.f32 %v1752_v11, %v111_v12 }
 0x114   :  { %v113_v14 = vmul.f32 0.5, %v112_v13 }
 0x116   :  { %v114_v15 = vsub.f32 1.5, %v113_v14 }
 0x118   :  { %v115_v17 = vmul.f32 %v1752_v11, %v114_v15 }
 0x11a   :  { %v119_v18 = vsel %vm118_vm2, %v1752_v11, %v115_v17 }
 0x11b   :  { %v120_v19 = vmul.f32 %v119_v18, %v108_v16 }
 0x11d   :  { %123 = vperm.xlu1 %1745, %v120_v19  }
 0x125   :  { %130 = vperm.xlu1 %1745, %v127_v20  }
 0x18f   :  { %v124_v21 = vpop.permute.xlu1 %123 }
 0x190   :  { %v126_v22 = vmul.f32 %v124_v21, %v103_v5 }
 0x197   :  { %v131_v23 = vpop.permute.xlu1 %130 }
 0x198   :  { %v133_v24 = vadd.f32 %v131_v23, %v126_v22 }
 0x19a   :  { %v134_v25 = vmax.f32 %v133_v24, 0.0 }
 0x19c   :  { %v135_v26 = vmul.f32 %v1995_v3, %v134_v25  ;;  %v252_v25 = vld [vmem:[%s2631_s30 + $0x10] sm:$0xff] }
 0x19e   :  { %176 = vmatpush.msra.mxu0 %v135_v26 }
 0x19f   :  { %1698 = vmatmul.msk.f32.vlgmr.msra.gmra.mxu0 %vm142_vm3, %v136_v27 }
 0x1a7   :  { %1699 = vmatmul.msk.f32.gmra.mxu0 %vm142_vm3, %v137_v28 }
 0x1af   :  { %1700 = vmatmul.msk.f32.gmra.mxu0 %vm142_vm3, %v138_v29 }
 0x1b7   :  { %1701 = vmatmul.msk.f32.gmra.mxu0 %vm142_vm3, %v139_v30 }
 0x1bf   :  { %1702 = vmatmul.msk.f32.gmra.mxu0 %vm142_vm3, %v140_v31 }
 0x1c7   :  { %1703 = vmatmul.msk.f32.gmra.mxu0 %vm142_vm3, %v141_v32 }
 0x21c   :  { %v178_v33 = vpop.f32.mrf.mxu0 }
 0x224   :  { %v181_v34 = vpop.f32.mrf.mxu0 }
 0x22c   :  { %v184_v35 = vpop.f32.mrf.mxu0 }
 0x22d   :  { %200 = vadd.xlane.f32.xlu1 %v184_v35 }
 0x234   :  { %v187_v36 = vpop.f32.mrf.mxu0 }
 0x235   :  { %202 = vadd.xlane.f32.xlu0 %v187_v36 }
 0x23c   :  { %v190_v37 = vpop.f32.mrf.mxu0 }
 0x23d   :  { %196 = vadd.xlane.f32.xlu0 %v178_v33  ;;  %204 = vadd.xlane.f32.xlu2 %v190_v37 }
 0x244   :  { %v193_v39 = vpop.f32.mrf.mxu0 }
 0x245   :  { %206 = vadd.xlane.f32.xlu2 %v193_v39 }
 0x246   :  { %397 = vperm.xlu1 %1745, %v369_v38  }
 0x24d   :  { %198 = vadd.xlane.f32.xlu2 %v181_v34 }
 0x2a0   :  { %v201_v40 = vpop.xlane.xlu1 %200 }
 0x2a1   :  { %v210_v41 = vmul.f32 0.03125, %v201_v40  ;;  %v253_v40 = vld [vmem:[%s2631_s30 + $0x18] sm:$0xff] }
 0x2a3   :  { %v216_v42 = vsub.f32 %v184_v35, %v210_v41 }
 0x2a5   :  { %v2028_v43 = vmul.f32 %v1995_v3, %v216_v42 }
 0x2a7   :  { %v228_v44 = vmul.f32 %v2028_v43, %v2028_v43 }
 0x2a8   :  { %v203_v45 = vpop.xlane.xlu0 %202 }
 0x2a9   :  { %v211_v46 = vmul.f32 0.03125, %v203_v45  ;;  %236 = vadd.xlane.f32.xlu0 %v228_v44 }
 0x2ab   :  { %v217_v47 = vsub.f32 %v187_v36, %v211_v46 }
 0x2ad   :  { %v2033_v48 = vmul.f32 %v1995_v3, %v217_v47 }
 0x2af   :  { %v229_v49 = vmul.f32 %v2033_v48, %v2033_v48 }
 0x2b0   :  { %v197_v50 = vpop.xlane.xlu0 %196  ;;  %v205_v51 = vpop.xlane.xlu2 %204 }
 0x2b1   :  { %v212_v52 = vmul.f32 0.03125, %v205_v51  ;;  %238 = vadd.xlane.f32.xlu2 %v229_v49  ;;  %v208_v53 = vmul.f32 0.03125, %v197_v50 }
 0x2b3   :  { %v218_v54 = vsub.f32 %v190_v37, %v212_v52  ;;  %v214_v56 = vsub.f32 %v178_v33, %v208_v53  ;;  %v254_v53 = vld [vmem:[%s2631_s30 + $0x20] sm:$0xff] }
 0x2b5   :  { %v2038_v55 = vmul.f32 %v1995_v3, %v218_v54  ;;  %v2043_v61 = vmul.f32 %v1995_v3, %v214_v56 }
 0x2b7   :  { %v230_v57 = vmul.f32 %v2038_v55, %v2038_v55  ;;  %v226_v63 = vmul.f32 %v2043_v61, %v2043_v61 }
 0x2b8   :  { %v207_v58 = vpop.xlane.xlu2 %206 }
 0x2b9   :  { %v213_v59 = vmul.f32 0.03125, %v207_v58  ;;  %240 = vadd.xlane.f32.xlu0 %v230_v57 }
 0x2bb   :  { %v219_v60 = vsub.f32 %v193_v39, %v213_v59 }
 0x2bd   :  { %v2046_v62 = vmul.f32 %v1995_v3, %v219_v60 }
 0x2bf   :  { %v231_v1 = vmul.f32 %v2046_v62, %v2046_v62 }
 0x2c0   :  { %v199_v2 = vpop.xlane.xlu2 %198 }
 0x2c1   :  { %v209_v4 = vmul.f32 0.03125, %v199_v2  ;;  %232 = vadd.xlane.f32.xlu0 %v226_v63  ;;  %242 = vadd.xlane.f32.xlu2 %v231_v1 }
 0x2c3   :  { %v215_v5 = vsub.f32 %v181_v34, %v209_v4 }
 0x2c5   :  { %v2053_v6 = vmul.f32 %v1995_v3, %v215_v5 }
 0x2c7   :  { %v227_v7 = vmul.f32 %v2053_v6, %v2053_v6 }
 0x2c9   :  { %234 = vadd.xlane.f32.xlu2 %v227_v7 }
 0x2e1   :  { %392 = vperm.xlu2 %1746, %v368_v8   ;;  %v255_v8 = vld [vmem:[%s2631_s30 + $0x28] sm:$0xff] }
 0x31c   :  { %v237_v9 = vpop.xlane.xlu0 %236 }
 0x31d   :  { %v246_v10 = vmul.f32 0.03125, %v237_v9 }
 0x31f   :  { %v258_v11 = vadd.f32 1e-05, %v246_v10 }
 0x321   :  { %1753 = vrsqrt.f32 %v258_v11  ;;  %vm288_vm5 = vweird.f32 %v258_v11 }
 0x324   :  { %v239_v12 = vpop.xlane.xlu2 %238 }
 0x325   :  { %v247_v13 = vmul.f32 0.03125, %v239_v12 }
 0x327   :  { %v1754_v14 = vpop.eup %1753  ;;  %v259_v15 = vadd.f32 1e-05, %v247_v13 }
 0x328   :  { %v283_v16 = vmul.f32 %v1754_v14, %v258_v11  ;;  %vm289_vm4 = vweird.f32 %v1754_v14  ;;  %v366_v11 = vld [vmem:[%s2630_s1 + $0x10] sm:$0xff] }
 0x329   :  { %1755 = vrsqrt.f32 %v259_v15  ;;  %vm290_vm6 = vmor %vm288_vm5, %vm289_vm4  ;;  %vm298_vm8 = vweird.f32 %v259_v15 }
 0x32a   :  { %v284_v17 = vmul.f32 %v1754_v14, %v283_v16 }
 0x32c   :  { %v285_v18 = vmul.f32 0.5, %v284_v17  ;;  %v241_v19 = vpop.xlane.xlu0 %240  ;;  %v251_v17 = vld [vmem:[%s2631_s30 + $0x8] sm:$0xff] }
 0x32d   :  { %v248_v20 = vmul.f32 0.03125, %v241_v19 }
 0x32e   :  { %v286_v21 = vsub.f32 1.5, %v285_v18 }
 0x32f   :  { %v1756_v22 = vpop.eup %1755  ;;  %v260_v23 = vadd.f32 1e-05, %v248_v20  ;;  %v364_v20 = vld [vmem:[%s2630_s1] sm:$0xff] }
 0x330   :  { %v293_v24 = vmul.f32 %v1756_v22, %v259_v15  ;;  %v287_v26 = vmul.f32 %v1754_v14, %v286_v21  ;;  %vm299_vm7 = vweird.f32 %v1756_v22 }
 0x331   :  { %1757 = vrsqrt.f32 %v260_v23  ;;  %vm300_vm9 = vmor %vm298_vm8, %vm299_vm7  ;;  %vm308_vm11 = vweird.f32 %v260_v23 }
 0x332   :  { %v294_v27 = vmul.f32 %v1756_v22, %v293_v24  ;;  %v291_v28 = vsel %vm290_vm6, %v1754_v14, %v287_v26  ;;  %vm458_vm6 = vcmask 392192  }
 0x333   :  { %v324_v29 = vmul.f32 %v291_v28, %v252_v25  ;;  %v250_v25 = vld [vmem:[%s2631_s30] sm:$0xff]  ;;  %s1835_s30 = smov 127  }
 0x334   :  { %v295_v30 = vmul.f32 0.5, %v294_v27  ;;  %v233_v31 = vpop.xlane.xlu0 %232  ;;  %v243_v32 = vpop.xlane.xlu2 %242  ;;  %v365_v27 = vld [vmem:[%s2630_s1 + $0x8] sm:$0xff] }
 0x335   :  { %v244_v33 = vmul.f32 0.03125, %v233_v31  ;;  %v249_v34 = vmul.f32 0.03125, %v243_v32  ;;  %340 = vperm.xlu1 %1745, %v324_v29  }
 0x336   :  { %v296_v35 = vsub.f32 1.5, %v295_v30 }
 0x337   :  { %v1758_v36 = vpop.eup %1757  ;;  %v261_v37 = vadd.f32 1e-05, %v249_v34  ;;  %v2063_v39 = vadd.f32 1e-05, %v244_v33  ;;  %v398_v33 = vpop.permute.xlu1 %397 }
 0x338   :  { %v303_v38 = vmul.f32 %v1758_v36, %v260_v23  ;;  %v297_v41 = vmul.f32 %v1756_v22, %v296_v35  ;;  %vm309_vm10 = vweird.f32 %v1758_v36 }
 0x339   :  { %1759 = vrsqrt.f32 %v261_v37  ;;  %vm310_vm12 = vmor %vm308_vm11, %vm309_vm10  ;;  %vm318_vm14 = vweird.f32 %v261_v37  ;;  %vm268_vm4 = vweird.f32 %v2063_v39 }
 0x33a   :  { %v304_v42 = vmul.f32 %v1758_v36, %v303_v38  ;;  %v301_v44 = vsel %vm300_vm9, %v1756_v22, %v297_v41  ;;  %1761 = vrsqrt.f32 %v2063_v39  ;;  %v367_v22 = vld [vmem:[%s2630_s1 + $0x18] sm:$0xff]  ;;  %s1836_s1 = smov 1  }
 0x33b   :  { %v325_v45 = vmul.f32 %v301_v44, %v253_v40 }
 0x33c   :  { %v305_v46 = vmul.f32 0.5, %v304_v42  ;;  %v235_v47 = vpop.xlane.xlu2 %234 }
 0x33d   :  { %v245_v49 = vmul.f32 0.03125, %v235_v47  ;;  %345 = vperm.xlu2 %1746, %v325_v45  }
 0x33e   :  { %v306_v50 = vsub.f32 1.5, %v305_v46 }
 0x33f   :  { %v257_v51 = vadd.f32 1e-05, %v245_v49  ;;  %v1760_v52 = vpop.eup %1759 }
 0x340   :  { %v307_v54 = vmul.f32 %v1758_v36, %v306_v50  ;;  %v313_v56 = vmul.f32 %v1760_v52, %v261_v37  ;;  %v1762_v57 = vpop.eup %1761  ;;  %vm319_vm13 = vweird.f32 %v1760_v52 }
 0x341   :  { %1763 = vrsqrt.f32 %v257_v51  ;;  %v263_v63 = vmul.f32 %v1762_v57, %v2063_v39  ;;  %vm320_vm15 = vmor %vm318_vm14, %vm319_vm13  ;;  %vm278_vm1 = vweird.f32 %v257_v51  ;;  %vm269_vm3 = vweird.f32 %v1762_v57 }
 0x342   :  { %v311_v58 = vsel %vm310_vm12, %v1758_v36, %v307_v54  ;;  %v314_v59 = vmul.f32 %v1760_v52, %v313_v56  ;;  %vm270_vm5 = vmor %vm268_vm4, %vm269_vm3 }
 0x343   :  { %v326_v60 = vmul.f32 %v311_v58, %v254_v53  ;;  %v264_v7 = vmul.f32 %v1762_v57, %v263_v63 }
 0x344   :  { %v315_v1 = vmul.f32 0.5, %v314_v59  ;;  %v393_v29 = vpop.permute.xlu2 %392 }
 0x345   :  { %350 = vperm.xlu0 %1747, %v326_v60   ;;  %v265_v15 = vmul.f32 0.5, %v264_v7  ;;  %v454_v60 = vld [vmem:[%s2633_s9] sm:$0xff] }
 0x346   :  { %v316_v4 = vsub.f32 1.5, %v315_v1 }
 0x347   :  { %v1764_v2 = vpop.eup %1763  ;;  %v266_v19 = vsub.f32 1.5, %v265_v15 }
 0x348   :  { %v273_v5 = vmul.f32 %v1764_v2, %v257_v51  ;;  %v317_v9 = vmul.f32 %v1760_v52, %v316_v4  ;;  %vm279_vm0 = vweird.f32 %v1764_v2  ;;  %v455_v4 = vld [vmem:[%s2633_s9 + $0x8] sm:$0xff]  ;;  %s2636_s9 = sld [smem:[#allocation14_spill]] }
 0x349   :  { %vm280_vm2 = vmor %vm278_vm1, %vm279_vm0  ;;  %v267_v24 = vmul.f32 %v1762_v57, %v266_v19  ;;  %vm674_vm0 = vcmask 195584  }
 0x34a   :  { %v274_v10 = vmul.f32 %v1764_v2, %v273_v5  ;;  %v321_v12 = vsel %vm320_vm15, %v1760_v52, %v317_v9  ;;  %v2134_v9 = vld [vmem:[%s2634_s29] ss:$0 sm:$0xff] }
 0x34b   :  { %v327_v14 = vmul.f32 %v321_v12, %v255_v8  ;;  %v271_v26 = vsel %vm270_vm5, %v1762_v57, %v267_v24 }
 0x34c   :  { %v275_v13 = vmul.f32 0.5, %v274_v10  ;;  %v322_v28 = vmul.f32 %v271_v26, %v250_v25 }
 0x34d   :  { %382 = vperm.xlu0 %1747, %v366_v11   ;;  %355 = vperm.xlu2 %1746, %v327_v14  }
 0x34e   :  { %v276_v16 = vsub.f32 1.5, %v275_v13  ;;  %v456_v26 = vld [vmem:[%s2636_s9] sm:$0xff] }
 0x350   :  { %v277_v18 = vmul.f32 %v1764_v2, %v276_v16 }
 0x352   :  { %v281_v21 = vsel %vm280_vm2, %v1764_v2, %v277_v18 }
 0x353   :  { %v323_v23 = vmul.f32 %v281_v21, %v251_v17  ;;  %v517_v21 = vld [vmem:[%s2635_s12] sm:$0xff] }
 0x355   :  { %372 = vperm.xlu0 %1747, %v364_v20   ;;  %335 = vperm.xlu1 %1745, %v323_v23  }
 0x356   :  { %387 = vperm.xlu2 %1746, %v367_v22  }
 0x35d   :  { %377 = vperm.xlu1 %1745, %v365_v27   ;;  %v518_v27 = vld [vmem:[%s2635_s12 + $0x8] sm:$0xff] }
 0x35e   :  { %330 = vperm.xlu2 %1746, %v322_v28   ;;  %v457_v28 = vld [vmem:[%s2636_s9 + $0x8] sm:$0xff] }
 0x397   :  { %v346_v30 = vpop.permute.xlu2 %345 }
 0x398   :  { %v361_v36 = vmul.f32 %v346_v30, %v2033_v48 }
 0x3a7   :  { %v356_v31 = vpop.permute.xlu2 %355  ;;  %v341_v44 = vpop.permute.xlu1 %340 }
 0x3a8   :  { %v363_v32 = vmul.f32 %v356_v31, %v2046_v62  ;;  %v360_v62 = vmul.f32 %v341_v44, %v2028_v43 }
 0x3aa   :  { %v405_v34 = vadd.f32 %v398_v33, %v363_v32 }
 0x3ac   :  { %v411_v35 = vmax.f32 %v405_v34, 0.0 }
 0x3ae   :  { %504 = vmatpush.msra.mxu2 %v411_v35 }
 0x3b0   :  { %v388_v37 = vpop.permute.xlu2 %387 }
 0x3b1   :  { %v403_v38 = vadd.f32 %v388_v37, %v361_v36 }
 0x3b3   :  { %v409_v39 = vmax.f32 %v403_v38, 0.0 }
 0x3b5   :  { %439 = vrot.lane.b32.xlu2 %v409_v39, %s1835_s30 }
 0x3b7   :  { %v351_v40 = vpop.permute.xlu0 %350 }
 0x3b8   :  { %v362_v41 = vmul.f32 %v351_v40, %v2038_v55  ;;  %v331_v49 = vpop.permute.xlu2 %330 }
 0x3b9   :  { %v358_v55 = vmul.f32 %v331_v49, %v2043_v61 }
 0x3ba   :  { %v404_v42 = vadd.f32 %v393_v29, %v362_v41 }
 0x3bc   :  { %v410_v45 = vmax.f32 %v404_v42, 0.0 }
 0x3bd   :  { %443 = vrot.lane.b32.xlu2 %v411_v35, %s1835_s30 }
 0x3be   :  { %441 = vrot.lane.b32.xlu1 %v410_v45, %s1835_s30  ;;  %505 = vmatpush.msra.mxu2 %v410_v45 }
 0x3bf   :  { %v383_v48 = vpop.permute.xlu0 %382 }
 0x3c0   :  { %v402_v46 = vadd.f32 %v383_v48, %v360_v62  ;;  %506 = vmatpush.msra.mxu2 %v409_v39 }
 0x3c2   :  { %v408_v47 = vmax.f32 %v402_v46, 0.0 }
 0x3c4   :  { %437 = vrot.lane.b32.xlu0 %v408_v47, %s1835_s30  ;;  %507 = vmatpush.msra.mxu2 %v408_v47 }
 0x3c5   :  { %418 = vrot.lane.b32.xlu2 %v409_v39, %s1836_s1 }
 0x3c6   :  { %420 = vrot.lane.b32.xlu1 %v410_v45, %s1836_s1 }
 0x3c7   :  { %v373_v50 = vpop.permute.xlu0 %372  ;;  %v336_v43 = vpop.permute.xlu1 %335 }
 0x3c8   :  { %v400_v51 = vadd.f32 %v373_v50, %v358_v55  ;;  %v359_v53 = vmul.f32 %v336_v43, %v2053_v6  ;;  %v2117_v6 = vld [vmem:[%s2632_s4] ss:$0 sm:$0xff] }
 0x3ca   :  { %v406_v52 = vmax.f32 %v400_v51, 0.0 }
 0x3cc   :  { %422 = vrot.lane.b32.xlu0 %v411_v35, %s1836_s1 }
 0x3cd   :  { %433 = vrot.lane.b32.xlu2 %v406_v52, %s1835_s30 }
 0x3cf   :  { %v378_v54 = vpop.permute.xlu1 %377 }
 0x3d0   :  { %v401_v56 = vadd.f32 %v378_v54, %v359_v53  ;;  %v643_v54 = vld [vmem:[%s2586_s13 + $0x10] sm:$0xff] }
 0x3d2   :  { %v407_v57 = vmax.f32 %v401_v56, 0.0 }
 0x3d4   :  { %435 = vrot.lane.b32.xlu1 %v407_v57, %s1835_s30  ;;  %416 = vrot.lane.b32.xlu0 %v408_v47, %s1836_s1 }
 0x3d5   :  { %508 = vmatpush.msra.mxu2 %v407_v57 }
 0x3d7   :  { %509 = vmatpush.msra.mxu2 %v406_v52 }
 0x3d8   :  { %1706 = vmatmul.msk.f32.vlgmr.msra.gmra.mxu2 %vm458_vm6, %v454_v60 }
 0x3dc   :  { %414 = vrot.lane.b32.xlu1 %v407_v57, %s1836_s1  ;;  %412 = vrot.lane.b32.xlu0 %v406_v52, %s1836_s1 }
 0x3e0   :  { %1707 = vmatmul.msk.f32.gmra.mxu2 %vm458_vm6, %v455_v4 }
 0x406   :  { %557 = vadd.xlane.f32.xlu0 %v1988_v0 }
 0x40f   :  { %v440_v61 = vpop.permute.xlu2 %439 }
 0x410   :  { %v451_v2 = vmul.f32 %v2117_v6, %v440_v61 }
 0x417   :  { %v444_v58 = vpop.permute.xlu2 %443 }
 0x418   :  { %v453_v59 = vmul.f32 %v2117_v6, %v444_v58 }
 0x41a   :  { %535 = vmatpush.msra.mxu3 %v453_v59 }
 0x41f   :  { %v419_v8 = vpop.permute.xlu2 %418 }
 0x420   :  { %v430_v14 = vmul.f32 %v2134_v9, %v419_v8 }
 0x427   :  { %v434_v15 = vpop.permute.xlu2 %433 }
 0x428   :  { %v448_v20 = vmul.f32 %v2117_v6, %v434_v15 }
 0x430   :  { %v442_v63 = vpop.permute.xlu1 %441 }
 0x431   :  { %v452_v1 = vmul.f32 %v2117_v6, %v442_v63 }
 0x433   :  { %536 = vmatpush.msra.mxu3 %v452_v1 }
 0x435   :  { %537 = vmatpush.msra.mxu3 %v451_v2 }
 0x436   :  { %v438_v5 = vpop.permute.xlu0 %437 }
 0x437   :  { %v450_v7 = vmul.f32 %v2117_v6, %v438_v5 }
 0x438   :  { %v421_v10 = vpop.permute.xlu1 %420 }
 0x439   :  { %538 = vmatpush.msra.mxu3 %v450_v7  ;;  %v431_v13 = vmul.f32 %v2134_v9, %v421_v10  ;;  %v585_v10 = vld [vmem:[%s2637_s5 + $0x8] sm:$0xff] }
 0x43e   :  { %v423_v11 = vpop.permute.xlu0 %422 }
 0x43f   :  { %v432_v12 = vmul.f32 %v2134_v9, %v423_v11 }
 0x441   :  { %475 = vmatpush.msra.mxu1 %v432_v12 }
 0x443   :  { %476 = vmatpush.msra.mxu1 %v431_v13 }
 0x445   :  { %477 = vmatpush.msra.mxu1 %v430_v14 }
 0x446   :  { %v436_v16 = vpop.permute.xlu1 %435  ;;  %v417_v17 = vpop.permute.xlu0 %416 }
 0x447   :  { %v449_v18 = vmul.f32 %v2117_v6, %v436_v16  ;;  %v429_v19 = vmul.f32 %v2134_v9, %v417_v17 }
 0x449   :  { %478 = vmatpush.msra.mxu1 %v429_v19  ;;  %539 = vmatpush.msra.mxu3 %v449_v18 }
 0x44b   :  { %540 = vmatpush.msra.mxu3 %v448_v20  ;;  %v641_v20 = vld [vmem:[%s2586_s13] sm:$0xff] }
 0x44c   :  { %1708 = vmatmul.msk.f32.vlgmr.msra.gmra.mxu3 %vm458_vm6, %v517_v21 }
 0x44e   :  { %v415_v22 = vpop.permute.xlu1 %414  ;;  %v413_v23 = vpop.permute.xlu0 %412 }
 0x44f   :  { %v428_v24 = vmul.f32 %v2134_v9, %v415_v22  ;;  %v427_v25 = vmul.f32 %v2134_v9, %v413_v23 }
 0x451   :  { %479 = vmatpush.msra.mxu1 %v428_v24 }
 0x453   :  { %480 = vmatpush.msra.mxu1 %v427_v25  ;;  %v584_v25 = vld [vmem:[%s2637_s5] sm:$0xff] }
 0x454   :  { %1704 = vmatmul.msk.f32.vlgmr.msra.gmra.mxu1 %vm458_vm6, %v456_v26  ;;  %1709 = vmatmul.msk.f32.gmra.mxu3 %vm458_vm6, %v518_v27 }
 0x45b   :  { %v511_v29 = vpop.f32.mrf.mxu2 }
 0x45c   :  { %1705 = vmatmul.msk.f32.gmra.mxu1 %vm458_vm6, %v457_v28 }
 0x463   :  { %v514_v35 = vpop.f32.mrf.mxu2 }
 0x479   :  { %v558_v62 = vpop.xlane.xlu0 %557 }
 0x47a   :  { %v563_v49 = vmul.f32 0.03125, %v558_v62 }
 0x47c   :  { %v566_v50 = vsub.f32 %v1988_v0, %v563_v49 }
 0x47e   :  { %v2184_v52 = vmul.f32 %v1995_v3, %v566_v50 }
 0x480   :  { %v572_v53 = vmul.f32 %v2184_v52, %v2184_v52 }
 0x4cf   :  { %v542_v30 = vpop.f32.mrf.mxu3 }
 0x4d1   :  { %v482_v31 = vpop.f32.mrf.mxu1 }
 0x4d2   :  { %v512_v32 = vadd.f32 %v511_v29, %v482_v31 }
 0x4d4   :  { %v548_v33 = vadd.f32 %v542_v30, %v512_v32  ;;  %v586_v30 = vld [vmem:[%s2637_s5 + $0x10] sm:$0xff] }
 0x4d6   :  { %v2161_v34 = vmul.f32 %v1995_v3, %v548_v33  ;;  %v642_v33 = vld [vmem:[%s2586_s13 + $0x8] sm:$0xff] }
 0x4d7   :  { %v545_v37 = vpop.f32.mrf.mxu3 }
 0x4d8   :  { %552 = vst [vmem:[#allocation2 + $0x8] sm:$0xff] %v2161_v34  ;;  %559 = vadd.xlane.f32.xlu1 %v2161_v34 }
 0x4d9   :  { %v485_v36 = vpop.f32.mrf.mxu1 }
 0x4da   :  { %v515_v38 = vadd.f32 %v514_v35, %v485_v36 }
 0x4dc   :  { %v549_v39 = vadd.f32 %v545_v37, %v515_v38 }
 0x4de   :  { %v2166_v40 = vmul.f32 %v1995_v3, %v549_v39 }
 0x4e0   :  { %553 = vst [vmem:[#allocation2 + $0x10] sm:$0xff] %v2166_v40  ;;  %561 = vadd.xlane.f32.xlu2 %v2166_v40 }
 0x54b   :  { %v560_v41 = vpop.xlane.xlu1 %559 }
 0x54c   :  { %v564_v42 = vmul.f32 0.03125, %v560_v41 }
 0x54e   :  { %v567_v44 = vsub.f32 %v2161_v34, %v564_v42 }
 0x550   :  { %v2172_v45 = vmul.f32 %v1995_v3, %v567_v44 }
 0x552   :  { %v573_v48 = vmul.f32 %v2172_v45, %v2172_v45 }
 0x553   :  { %v562_v46 = vpop.xlane.xlu2 %561 }
 0x554   :  { %v565_v47 = vmul.f32 0.03125, %v562_v46  ;;  %577 = vadd.xlane.f32.xlu1 %v573_v48 }
 0x556   :  { %v568_v55 = vsub.f32 %v2166_v40, %v565_v47 }
 0x558   :  { %v2179_v43 = vmul.f32 %v1995_v3, %v568_v55 }
 0x55a   :  { %v574_v51 = vmul.f32 %v2179_v43, %v2179_v43 }
 0x55c   :  { %579 = vadd.xlane.f32.xlu2 %v574_v51 }
 0x564   :  { %575 = vadd.xlane.f32.xlu2 %v572_v53 }
 0x57c   :  { %656 = vperm.xlu2 %1746, %v643_v54   ;;  %v670_v54 = vld [vmem:[%s2587_s14 + $0x10] sm:$0xff] }
 0x5c7   :  { %v578_v0 = vpop.xlane.xlu1 %577 }
 0x5c8   :  { %v582_v56 = vmul.f32 0.03125, %v578_v0  ;;  %v671_v0 = vld [vmem:[%s2587_s14 + $0x18] sm:$0xff] }
 0x5ca   :  { %v588_v57 = vadd.f32 1e-05, %v582_v56  ;;  %v672_v56 = vld [vmem:[%s2587_s14 + $0x20] sm:$0xff] }
 0x5cc   :  { %1765 = vrsqrt.f32 %v588_v57  ;;  %vm606_vm8 = vweird.f32 %v588_v57 }
 0x5cf   :  { %v580_v61 = vpop.xlane.xlu2 %579 }
 0x5d0   :  { %v583_v58 = vmul.f32 0.03125, %v580_v61 }
 0x5d2   :  { %v1766_v59 = vpop.eup %1765  ;;  %v589_v60 = vadd.f32 1e-05, %v583_v58 }
 0x5d3   :  { %v601_v63 = vmul.f32 %v1766_v59, %v588_v57  ;;  %vm607_vm7 = vweird.f32 %v1766_v59  ;;  %v673_v57 = vld [vmem:[%s2587_s14 + $0x28] sm:$0xff] }
 0x5d4   :  { %1767 = vrsqrt.f32 %v589_v60  ;;  %vm608_vm9 = vmor %vm606_vm8, %vm607_vm7  ;;  %vm616_vm14 = vweird.f32 %v589_v60 }
 0x5d5   :  { %v602_v1 = vmul.f32 %v1766_v59, %v601_v63 }
 0x5d7   :  { %v603_v2 = vmul.f32 0.5, %v602_v1  ;;  %v576_v4 = vpop.xlane.xlu2 %575 }
 0x5d8   :  { %v581_v5 = vmul.f32 0.03125, %v576_v4 }
 0x5d9   :  { %v604_v7 = vsub.f32 1.5, %v603_v2 }
 0x5da   :  { %v587_v8 = vadd.f32 1e-05, %v581_v5  ;;  %v1768_v12 = vpop.eup %1767 }
 0x5db   :  { %v605_v11 = vmul.f32 %v1766_v59, %v604_v7  ;;  %v611_v15 = vmul.f32 %v1768_v12, %v589_v60  ;;  %vm617_vm13 = vweird.f32 %v1768_v12 }
 0x5dc   :  { %1769 = vrsqrt.f32 %v587_v8  ;;  %vm596_vm11 = vweird.f32 %v587_v8  ;;  %vm618_vm15 = vmor %vm616_vm14, %vm617_vm13 }
 0x5dd   :  { %v609_v13 = vsel %vm608_vm9, %v1766_v59, %v605_v11  ;;  %v612_v17 = vmul.f32 %v1768_v12, %v611_v15 }
 0x5de   :  { %v621_v14 = vmul.f32 %v609_v13, %v585_v10 }
 0x5df   :  { %v613_v21 = vmul.f32 0.5, %v612_v17  ;;  %v657_v39 = vpop.permute.xlu2 %656 }
 0x5e0   :  { %630 = vperm.xlu1 %1745, %v621_v14  }
 0x5e1   :  { %v614_v24 = vsub.f32 1.5, %v613_v21 }
 0x5e2   :  { %v1770_v16 = vpop.eup %1769 }
 0x5e3   :  { %v591_v18 = vmul.f32 %v1770_v16, %v587_v8  ;;  %vm597_vm10 = vweird.f32 %v1770_v16  ;;  %v615_v29 = vmul.f32 %v1768_v12, %v614_v24 }
 0x5e4   :  { %vm598_vm12 = vmor %vm596_vm11, %vm597_vm10 }
 0x5e5   :  { %v592_v19 = vmul.f32 %v1770_v16, %v591_v18  ;;  %v619_v31 = vsel %vm618_vm15, %v1768_v12, %v615_v29 }
 0x5e6   :  { %v622_v32 = vmul.f32 %v619_v31, %v586_v30 }
 0x5e7   :  { %v593_v22 = vmul.f32 0.5, %v592_v19 }
 0x5e8   :  { %646 = vperm.xlu1 %1745, %v641_v20  }
 0x5e9   :  { %v594_v23 = vsub.f32 1.5, %v593_v22 }
 0x5eb   :  { %v595_v26 = vmul.f32 %v1770_v16, %v594_v23 }
 0x5ed   :  { %v599_v27 = vsel %vm598_vm12, %v1770_v16, %v595_v26 }
 0x5ee   :  { %v620_v28 = vmul.f32 %v599_v27, %v584_v25 }
 0x5f0   :  { %625 = vperm.xlu0 %1747, %v620_v28  }
 0x5f8   :  { %635 = vperm.xlu0 %1747, %v622_v32  }
 0x600   :  { %651 = vperm.xlu0 %1747, %v642_v33  }
 0x652   :  { %v631_v36 = vpop.permute.xlu1 %630 }
 0x653   :  { %v639_v48 = vmul.f32 %v631_v36, %v2172_v45  ;;  %v669_v45 = vld [vmem:[%s2587_s14 + $0x8] sm:$0xff] }
 0x654   :  { %v901_v36 = vld [vmem:[%s2589_s16 + $0x28] sm:$0xff] }
 0x65a   :  { %v647_v62 = vpop.permute.xlu1 %646 }
 0x662   :  { %v626_v35 = vpop.permute.xlu0 %625 }
 0x663   :  { %v638_v41 = vmul.f32 %v626_v35, %v2184_v52  ;;  %v668_v52 = vld [vmem:[%s2587_s14] sm:$0xff]  ;;  %s1686_s14 = sshll.u32 %s2601_s28, 4  ;;  %s1687_s14 = int_to_ptr.hbm [resolvable:$true] %s1686_s14 }
 0x665   :  { %v659_v46 = vadd.f32 %v647_v62, %v638_v41 }
 0x667   :  { %v662_v50 = vmax.f32 %v659_v46, 0.0 }
 0x66a   :  { %v636_v37 = vpop.permute.xlu0 %635 }
 0x66b   :  { %v640_v38 = vmul.f32 %v636_v37, %v2179_v43  ;;  %v665_v43 = vmul.f32 %v1995_v3, %v662_v50  ;;  %v900_v37 = vld [vmem:[%s2589_s16 + $0x20] sm:$0xff] }
 0x66d   :  { %v661_v42 = vadd.f32 %v657_v39, %v640_v38 }
 0x66f   :  { %v664_v44 = vmax.f32 %v661_v42, 0.0 }
 0x671   :  { %v667_v47 = vmul.f32 %v1995_v3, %v664_v44 }
 0x672   :  { %v652_v49 = vpop.permute.xlu0 %651 }
 0x673   :  { %v660_v55 = vadd.f32 %v652_v49, %v639_v48  ;;  %706 = vmatpush.msrb.mxu1 %v667_v47 }
 0x675   :  { %v663_v51 = vmax.f32 %v660_v55, 0.0 }
 0x677   :  { %v666_v53 = vmul.f32 %v1995_v3, %v663_v51 }
 0x679   :  { %707 = vmatpush.msrb.mxu1 %v666_v53 }
 0x67b   :  { %708 = vmatpush.msrb.mxu1 %v665_v43 }
 0x67c   :  { %1710 = vmatmul.msk.f32.vlgmr.msrb.gmra.mxu1 %vm674_vm0, %v668_v52 }
 0x684   :  { %1711 = vmatmul.msk.f32.gmra.mxu1 %vm674_vm0, %v669_v45 }
 0x68c   :  { %1712 = vmatmul.msk.f32.gmra.mxu1 %vm674_vm0, %v670_v54 }
 0x694   :  { %1713 = vmatmul.msk.f32.gmra.mxu1 %vm674_vm0, %v671_v0 }
 0x69c   :  { %1714 = vmatmul.msk.f32.gmra.mxu1 %vm674_vm0, %v672_v56 }
 0x6a4   :  { %1715 = vmatmul.msk.f32.gmra.mxu1 %vm674_vm0, %v673_v57  ;;  %v785_v57 = vld [vmem:[%s2588_s15 + $0x18] sm:$0xff] }
 0x6f9   :  { %v710_v61 = vpop.f32.mrf.mxu1 }
 0x701   :  { %v713_v58 = vpop.f32.mrf.mxu1 }
 0x709   :  { %v716_v59 = vpop.f32.mrf.mxu1 }
 0x711   :  { %v719_v60 = vpop.f32.mrf.mxu1 }
 0x712   :  { %734 = vadd.xlane.f32.xlu1 %v719_v60 }
 0x719   :  { %v722_v63 = vpop.f32.mrf.mxu1 }
 0x71a   :  { %728 = vadd.xlane.f32.xlu1 %v710_v61  ;;  %736 = vadd.xlane.f32.xlu0 %v722_v63 }
 0x721   :  { %v725_v1 = vpop.f32.mrf.mxu1 }
 0x722   :  { %730 = vadd.xlane.f32.xlu0 %v713_v58  ;;  %738 = vadd.xlane.f32.xlu2 %v725_v1 }
 0x72a   :  { %732 = vadd.xlane.f32.xlu2 %v716_v59 }
 0x785   :  { %v735_v2 = vpop.xlane.xlu1 %734 }
 0x786   :  { %v743_v4 = vmul.f32 0.03125, %v735_v2 }
 0x788   :  { %v749_v5 = vsub.f32 %v719_v60, %v743_v4 }
 0x78a   :  { %v2231_v7 = vmul.f32 %v1995_v3, %v749_v5 }
 0x78c   :  { %v761_v8 = vmul.f32 %v2231_v7, %v2231_v7 }
 0x78d   :  { %v729_v10 = vpop.xlane.xlu1 %728  ;;  %v737_v11 = vpop.xlane.xlu0 %736 }
 0x78e   :  { %v740_v12 = vmul.f32 0.03125, %v729_v10  ;;  %v744_v13 = vmul.f32 0.03125, %v737_v11  ;;  %770 = vadd.xlane.f32.xlu1 %v761_v8 }
 0x790   :  { %v746_v14 = vsub.f32 %v710_v61, %v740_v12  ;;  %v750_v15 = vsub.f32 %v722_v63, %v744_v13 }
 0x792   :  { %v2236_v16 = vmul.f32 %v1995_v3, %v746_v14  ;;  %v2239_v17 = vmul.f32 %v1995_v3, %v750_v15 }
 0x794   :  { %v758_v18 = vmul.f32 %v2236_v16, %v2236_v16  ;;  %v762_v19 = vmul.f32 %v2239_v17, %v2239_v17 }
 0x795   :  { %v731_v20 = vpop.xlane.xlu0 %730  ;;  %v739_v21 = vpop.xlane.xlu2 %738 }
 0x796   :  { %v741_v22 = vmul.f32 0.03125, %v731_v20  ;;  %v745_v23 = vmul.f32 0.03125, %v739_v21  ;;  %764 = vadd.xlane.f32.xlu1 %v758_v18  ;;  %772 = vadd.xlane.f32.xlu0 %v762_v19  ;;  %v786_v18 = vld [vmem:[%s2588_s15 + $0x20] sm:$0xff] }
 0x798   :  { %v747_v24 = vsub.f32 %v713_v58, %v741_v22  ;;  %v751_v25 = vsub.f32 %v725_v1, %v745_v23 }
 0x79a   :  { %v2246_v26 = vmul.f32 %v1995_v3, %v747_v24  ;;  %v2249_v27 = vmul.f32 %v1995_v3, %v751_v25 }
 0x79c   :  { %v759_v28 = vmul.f32 %v2246_v26, %v2246_v26  ;;  %v763_v29 = vmul.f32 %v2249_v27, %v2249_v27 }
 0x79d   :  { %v733_v30 = vpop.xlane.xlu2 %732 }
 0x79e   :  { %v742_v31 = vmul.f32 0.03125, %v733_v30  ;;  %766 = vadd.xlane.f32.xlu0 %v759_v28  ;;  %774 = vadd.xlane.f32.xlu2 %v763_v29 }
 0x7a0   :  { %v748_v32 = vsub.f32 %v716_v59, %v742_v31 }
 0x7a2   :  { %v2256_v33 = vmul.f32 %v1995_v3, %v748_v32  ;;  %v783_v32 = vld [vmem:[%s2588_s15 + $0x8] sm:$0xff] }
 0x7a4   :  { %v760_v35 = vmul.f32 %v2256_v33, %v2256_v33 }
 0x7a6   :  { %768 = vadd.xlane.f32.xlu2 %v760_v35 }
 0x7af   :  { %929 = vperm.xlu1 %1745, %v901_v36  }
 0x7b2   :  { %924 = vperm.xlu0 %1747, %v900_v37   ;;  %v787_v37 = vld [vmem:[%s2588_s15 + $0x28] sm:$0xff] }
 0x801   :  { %v771_v38 = vpop.xlane.xlu1 %770 }
 0x802   :  { %v779_v39 = vmul.f32 0.03125, %v771_v38 }
 0x804   :  { %v791_v41 = vadd.f32 1e-05, %v779_v39 }
 0x806   :  { %1771 = vrsqrt.f32 %v791_v41  ;;  %vm830_vm2 = vweird.f32 %v791_v41 }
 0x809   :  { %v773_v3 = vpop.xlane.xlu0 %772  ;;  %v765_v46 = vpop.xlane.xlu1 %764 }
 0x80a   :  { %v780_v42 = vmul.f32 0.03125, %v773_v3  ;;  %v776_v55 = vmul.f32 0.03125, %v765_v46 }
 0x80c   :  { %v1772_v44 = vpop.eup %1771  ;;  %v792_v62 = vadd.f32 1e-05, %v780_v42  ;;  %v2266_v56 = vadd.f32 1e-05, %v776_v55 }
 0x80d   :  { %v825_v48 = vmul.f32 %v1772_v44, %v791_v41  ;;  %vm831_vm1 = vweird.f32 %v1772_v44 }
 0x80e   :  { %1773 = vrsqrt.f32 %v792_v62  ;;  %vm832_vm3 = vmor %vm830_vm2, %vm831_vm1  ;;  %vm840_vm5 = vweird.f32 %v792_v62  ;;  %vm800_vm2 = vweird.f32 %v2266_v56 }
 0x80f   :  { %v826_v47 = vmul.f32 %v1772_v44, %v825_v48 }
 0x811   :  { %v827_v49 = vmul.f32 0.5, %v826_v47  ;;  %v767_v50 = vpop.xlane.xlu0 %766  ;;  %v775_v51 = vpop.xlane.xlu2 %774  ;;  %v784_v47 = vld [vmem:[%s2588_s15 + $0x10] sm:$0xff] }
 0x812   :  { %v777_v53 = vmul.f32 0.03125, %v767_v50  ;;  %v781_v43 = vmul.f32 0.03125, %v775_v51  ;;  %v899_v51 = vld [vmem:[%s2589_s16 + $0x18] sm:$0xff] }
 0x813   :  { %v828_v52 = vsub.f32 1.5, %v827_v49 }
 0x814   :  { %v789_v45 = vadd.f32 1e-05, %v777_v53  ;;  %v793_v54 = vadd.f32 1e-05, %v781_v43  ;;  %v1774_v0 = vpop.eup %1773  ;;  %v897_v43 = vld [vmem:[%s2589_s16 + $0x8] sm:$0xff] }
 0x815   :  { %v829_v61 = vmul.f32 %v1772_v44, %v828_v52  ;;  %v835_v58 = vmul.f32 %v1774_v0, %v792_v62  ;;  %vm841_vm4 = vweird.f32 %v1774_v0 }
 0x816   :  { %1775 = vrsqrt.f32 %v789_v45  ;;  %vm842_vm7 = vmor %vm840_vm5, %vm841_vm4  ;;  %vm810_vm10 = vweird.f32 %v789_v45  ;;  %vm850_vm12 = vweird.f32 %v793_v54 }
 0x817   :  { %1777 = vrsqrt.f32 %v793_v54  ;;  %v833_v59 = vsel %vm832_vm3, %v1772_v44, %v829_v61  ;;  %v836_v60 = vmul.f32 %v1774_v0, %v835_v58  ;;  %v896_v61 = vld [vmem:[%s2589_s16] sm:$0xff] }
 0x818   :  { %v857_v63 = vmul.f32 %v833_v59, %v785_v57  ;;  %1779 = vrsqrt.f32 %v2266_v56 }
 0x819   :  { %v769_v1 = vpop.xlane.xlu2 %768  ;;  %v837_v2 = vmul.f32 0.5, %v836_v60 }
 0x81a   :  { %v778_v4 = vmul.f32 0.03125, %v769_v1  ;;  %877 = vperm.xlu2 %1746, %v857_v63  }
 0x81b   :  { %v838_v8 = vsub.f32 1.5, %v837_v2 }
 0x81c   :  { %v1776_v5 = vpop.eup %1775  ;;  %v790_v10 = vadd.f32 1e-05, %v778_v4 }
 0x81d   :  { %v1778_v11 = vpop.eup %1777  ;;  %v805_v12 = vmul.f32 %v1776_v5, %v789_v45  ;;  %v839_v19 = vmul.f32 %v1774_v0, %v838_v8  ;;  %vm811_vm8 = vweird.f32 %v1776_v5  ;;  %v782_v45 = vld [vmem:[%s2588_s15] sm:$0xff] }
 0x81e   :  { %v845_v13 = vmul.f32 %v1778_v11, %v793_v54  ;;  %1781 = vrsqrt.f32 %v790_v10  ;;  %v1780_v14 = vpop.eup %1779  ;;  %vm851_vm9 = vweird.f32 %v1778_v11  ;;  %vm812_vm11 = vmor %vm810_vm10, %vm811_vm8  ;;  %vm820_vm15 = vweird.f32 %v790_v10 }
 0x81f   :  { %v806_v15 = vmul.f32 %v1776_v5, %v805_v12  ;;  %v843_v22 = vsel %vm842_vm7, %v1774_v0, %v839_v19  ;;  %v795_v23 = vmul.f32 %v1780_v14, %v2266_v56  ;;  %vm852_vm13 = vmor %vm850_vm12, %vm851_vm9  ;;  %vm801_vm1 = vweird.f32 %v1780_v14  ;;  %v898_v0 = vld [vmem:[%s2589_s16 + $0x10] sm:$0xff] }
 0x820   :  { %v846_v20 = vmul.f32 %v1778_v11, %v845_v13  ;;  %v858_v25 = vmul.f32 %v843_v22, %v786_v18  ;;  %vm802_vm3 = vmor %vm800_vm2, %vm801_vm1 }
 0x821   :  { %v807_v21 = vmul.f32 0.5, %v806_v15  ;;  %v796_v36 = vmul.f32 %v1780_v14, %v795_v23  ;;  %v930_v60 = vpop.permute.xlu1 %929 }
 0x822   :  { %v847_v24 = vmul.f32 0.5, %v846_v20  ;;  %882 = vperm.xlu0 %1747, %v858_v25  }
 0x823   :  { %v808_v28 = vsub.f32 1.5, %v807_v21  ;;  %v797_v48 = vmul.f32 0.5, %v796_v36 }
 0x824   :  { %v1782_v29 = vpop.eup %1781  ;;  %v848_v30 = vsub.f32 1.5, %v847_v24 }
 0x825   :  { %v815_v31 = vmul.f32 %v1782_v29, %v790_v10  ;;  %v809_v35 = vmul.f32 %v1776_v5, %v808_v28  ;;  %vm821_vm14 = vweird.f32 %v1782_v29  ;;  %v798_v55 = vsub.f32 1.5, %v797_v48 }
 0x826   :  { %v849_v38 = vmul.f32 %v1778_v11, %v848_v30  ;;  %vm822_vm0 = vmor %vm820_vm15, %vm821_vm14 }
 0x827   :  { %v816_v39 = vmul.f32 %v1782_v29, %v815_v31  ;;  %v813_v41 = vsel %vm812_vm11, %v1776_v5, %v809_v35  ;;  %v799_v52 = vmul.f32 %v1780_v14, %v798_v55  ;;  %v925_v5 = vpop.permute.xlu0 %924 }
 0x828   :  { %v855_v3 = vmul.f32 %v813_v41, %v783_v32  ;;  %v853_v42 = vsel %vm852_vm13, %v1778_v11, %v849_v38  ;;  %v980_v32 = vld [vmem:[%s2591_s18] sm:$0xff] }
 0x829   :  { %v817_v44 = vmul.f32 0.5, %v816_v39  ;;  %v859_v62 = vmul.f32 %v853_v42, %v787_v37  ;;  %v803_v54 = vsel %vm802_vm3, %v1780_v14, %v799_v52  ;;  %v981_v39 = vld [vmem:[%s2591_s18 + $0x8] sm:$0xff] }
 0x82a   :  { %867 = vperm.xlu0 %1747, %v855_v3   ;;  %v854_v57 = vmul.f32 %v803_v54, %v782_v45 }
 0x82b   :  { %v818_v46 = vsub.f32 1.5, %v817_v44  ;;  %887 = vperm.xlu2 %1746, %v859_v62  }
 0x82d   :  { %v819_v49 = vmul.f32 %v1782_v29, %v818_v46  ;;  %v982_v46 = vld [vmem:[%s2590_s17] sm:$0xff] }
 0x82f   :  { %v823_v50 = vsel %vm822_vm0, %v1782_v29, %v819_v49 }
 0x830   :  { %v856_v53 = vmul.f32 %v823_v50, %v784_v47 }
 0x832   :  { %872 = vperm.xlu1 %1745, %v856_v53   ;;  %909 = vperm.xlu0 %1747, %v897_v43  }
 0x833   :  { %919 = vperm.xlu2 %1746, %v899_v51  }
 0x83a   :  { %914 = vperm.xlu1 %1745, %v898_v0   ;;  %v1042_v0 = vld [vmem:[%s2592_s19] sm:$0xff] }
 0x83b   :  { %862 = vperm.xlu2 %1746, %v854_v57   ;;  %v1043_v57 = vld [vmem:[%s2592_s19 + $0x8] sm:$0xff] }
 0x842   :  { %904 = vperm.xlu1 %1745, %v896_v61  }
 0x874   :  { %v878_v56 = vpop.permute.xlu2 %877 }
 0x875   :  { %v893_v2 = vmul.f32 %v878_v56, %v2231_v7 }
 0x885   :  { %v888_v58 = vpop.permute.xlu2 %887 }
 0x886   :  { %v895_v59 = vmul.f32 %v888_v58, %v2249_v27 }
 0x888   :  { %v937_v63 = vadd.f32 %v930_v60, %v895_v59 }
 0x88a   :  { %v943_v1 = vmax.f32 %v937_v63, 0.0 }
 0x88c   :  { %954 = vrot.lane.b32.xlu2 %v943_v1, %s1836_s1  ;;  %1029 = vmatpush.msrb.mxu3 %v943_v1 }
 0x88d   :  { %v920_v4 = vpop.permute.xlu2 %919 }
 0x88e   :  { %v935_v8 = vadd.f32 %v920_v4, %v893_v2 }
 0x890   :  { %v941_v10 = vmax.f32 %v935_v8, 0.0 }
 0x892   :  { %950 = vrot.lane.b32.xlu1 %v941_v10, %s1836_s1 }
 0x894   :  { %v883_v11 = vpop.permute.xlu0 %882 }
 0x895   :  { %v894_v12 = vmul.f32 %v883_v11, %v2239_v17  ;;  %v863_v24 = vpop.permute.xlu2 %862 }
 0x896   :  { %v890_v25 = vmul.f32 %v863_v24, %v2236_v16 }
 0x897   :  { %v936_v13 = vadd.f32 %v925_v5, %v894_v12  ;;  %v1079_v12 = vld [vmem:[#allocation2] sm:$0xff] }
 0x899   :  { %v942_v14 = vmax.f32 %v936_v13, 0.0 }
 0x89b   :  { %952 = vrot.lane.b32.xlu0 %v942_v14, %s1836_s1  ;;  %1030 = vmatpush.msrb.mxu3 %v942_v14 }
 0x89c   :  { %v868_v27 = vpop.permute.xlu0 %867 }
 0x89d   :  { %1031 = vmatpush.msrb.mxu3 %v941_v10  ;;  %v891_v15 = vmul.f32 %v868_v27, %v2246_v26 }
 0x8a4   :  { %v873_v7 = vpop.permute.xlu1 %872  ;;  %v910_v18 = vpop.permute.xlu0 %909 }
 0x8a5   :  { %v933_v19 = vadd.f32 %v910_v18, %v891_v15  ;;  %v892_v21 = vmul.f32 %v873_v7, %v2256_v33 }
 0x8a7   :  { %v939_v20 = vmax.f32 %v933_v19, 0.0 }
 0x8a9   :  { %946 = vrot.lane.b32.xlu0 %v939_v20, %s1836_s1 }
 0x8ac   :  { %v915_v22 = vpop.permute.xlu1 %914 }
 0x8ad   :  { %v934_v23 = vadd.f32 %v915_v22, %v892_v21 }
 0x8af   :  { %v940_v17 = vmax.f32 %v934_v23, 0.0 }
 0x8b1   :  { %948 = vrot.lane.b32.xlu2 %v940_v17, %s1836_s1  ;;  %1032 = vmatpush.msrb.mxu3 %v940_v17 }
 0x8b2   :  { %970 = vrot.lane.b32.xlu0 %v942_v14, %s1835_s30 }
 0x8b3   :  { %1033 = vmatpush.msrb.mxu3 %v939_v20 }
 0x8b4   :  { %v905_v26 = vpop.permute.xlu1 %904 }
 0x8b5   :  { %v932_v28 = vadd.f32 %v905_v26, %v890_v25 }
 0x8b7   :  { %v938_v29 = vmax.f32 %v932_v28, 0.0 }
 0x8b9   :  { %972 = vrot.lane.b32.xlu2 %v943_v1, %s1835_s30  ;;  %944 = vrot.lane.b32.xlu1 %v938_v29, %s1836_s1 }
 0x8ba   :  { %1034 = vmatpush.msrb.mxu3 %v938_v29  ;;  %964 = vrot.lane.b32.xlu0 %v939_v20, %s1835_s30 }
 0x8bb   :  { %1718 = vmatmul.msk.f32.vlgmr.msrb.gmra.mxu3 %vm458_vm6, %v980_v32 }
 0x8c1   :  { %966 = vrot.lane.b32.xlu2 %v940_v17, %s1835_s30  ;;  %968 = vrot.lane.b32.xlu1 %v941_v10, %s1835_s30 }
 0x8c3   :  { %1719 = vmatmul.msk.f32.gmra.mxu3 %vm458_vm6, %v981_v39 }
 0x8c9   :  { %962 = vrot.lane.b32.xlu1 %v938_v29, %s1835_s30 }
 0x8e6   :  { %v955_v16 = vpop.permute.xlu2 %954 }
 0x8e7   :  { %v961_v33 = vmul.f32 %v2134_v9, %v955_v16 }
 0x8e9   :  { %1000 = vmatpush.msrb.mxu2 %v961_v33 }
 0x8f3   :  { %1088 = vadd.xlane.f32.xlu1 %v2166_v40 }
 0x904   :  { %v951_v30 = vpop.permute.xlu1 %950 }
 0x905   :  { %v959_v37 = vmul.f32 %v2134_v9, %v951_v30 }
 0x90b   :  { %v949_v36 = vpop.permute.xlu2 %948 }
 0x90c   :  { %v958_v38 = vmul.f32 %v2134_v9, %v949_v36 }
 0x90d   :  { %v953_v31 = vpop.permute.xlu0 %952 }
 0x90e   :  { %v960_v35 = vmul.f32 %v2134_v9, %v953_v31 }
 0x910   :  { %1001 = vmatpush.msrb.mxu2 %v960_v35 }
 0x912   :  { %1002 = vmatpush.msrb.mxu2 %v959_v37 }
 0x913   :  { %v973_v42 = vpop.permute.xlu2 %972 }
 0x914   :  { %1003 = vmatpush.msrb.mxu2 %v958_v38  ;;  %v979_v47 = vmul.f32 %v2117_v6, %v973_v42 }
 0x91b   :  { %v947_v41 = vpop.permute.xlu0 %946  ;;  %v967_v55 = vpop.permute.xlu2 %966 }
 0x91c   :  { %v957_v3 = vmul.f32 %v2134_v9, %v947_v41  ;;  %v976_v43 = vmul.f32 %v2117_v6, %v967_v55  ;;  %v1226_v55 = vld [vmem:[%s2594_s21 + $0x10] sm:$0xff] }
 0x91e   :  { %1004 = vmatpush.msrb.mxu2 %v957_v3 }
 0x924   :  { %v971_v44 = vpop.permute.xlu0 %970 }
 0x925   :  { %v978_v49 = vmul.f32 %v2117_v6, %v971_v44 }
 0x92b   :  { %v945_v62 = vpop.permute.xlu1 %944 }
 0x92c   :  { %v956_v48 = vmul.f32 %v2134_v9, %v945_v62  ;;  %v983_v9 = vld [vmem:[%s2590_s17 + $0x8] sm:$0xff]  ;;  %v965_v53 = vpop.permute.xlu0 %964  ;;  %v1131_v62 = vld [vmem:[%s2593_s20 + $0x10] sm:$0xff] }
 0x92d   :  { %v975_v52 = vmul.f32 %v2117_v6, %v965_v53 }
 0x92e   :  { %1005 = vmatpush.msrb.mxu2 %v956_v48 }
 0x92f   :  { %1716 = vmatmul.msk.f32.vlgmr.msrb.gmra.mxu2 %vm458_vm6, %v982_v46  ;;  %v1228_v46 = vld [vmem:[%s2594_s21 + $0x20] sm:$0xff] }
 0x930   :  { %1060 = vmatpush.msra.mxu2 %v979_v47 }
 0x932   :  { %1061 = vmatpush.msra.mxu2 %v978_v49  ;;  %v1227_v49 = vld [vmem:[%s2594_s21 + $0x18] sm:$0xff] }
 0x933   :  { %v969_v50 = vpop.permute.xlu1 %968 }
 0x934   :  { %v977_v51 = vmul.f32 %v2117_v6, %v969_v50 }
 0x936   :  { %1062 = vmatpush.msra.mxu2 %v977_v51 }
 0x937   :  { %1717 = vmatmul.msk.f32.gmra.mxu2 %vm458_vm6, %v983_v9 }
 0x938   :  { %1063 = vmatpush.msra.mxu2 %v976_v43 }
 0x93a   :  { %1064 = vmatpush.msra.mxu2 %v975_v52 }
 0x93b   :  { %v963_v45 = vpop.permute.xlu1 %962 }
 0x93c   :  { %v974_v54 = vmul.f32 %v2117_v6, %v963_v45  ;;  %v2359_v6 = vld [vmem:[%s2626_s6] ss:$0 sm:$0xff] }
 0x93e   :  { %1065 = vmatpush.msra.mxu2 %v974_v54  ;;  %v1036_v58 = vpop.f32.mrf.mxu3 }
 0x93f   :  { %1720 = vmatmul.msk.f32.vlgmr.msra.gmra.mxu2 %vm458_vm6, %v1042_v0 }
 0x946   :  { %v1039_v4 = vpop.f32.mrf.mxu3 }
 0x947   :  { %1721 = vmatmul.msk.f32.gmra.mxu2 %vm458_vm6, %v1043_v57 }
 0x966   :  { %v1089_v2 = vpop.xlane.xlu1 %1088 }
 0x967   :  { %v1096_v5 = vmul.f32 0.03125, %v1089_v2 }
 0x969   :  { %v1101_v13 = vsub.f32 %v2166_v40, %v1096_v5 }
 0x96b   :  { %v2365_v27 = vmul.f32 %v2359_v6, %v1101_v13 }
 0x96d   :  { %v1111_v7 = vmul.f32 %v2365_v27, %v2365_v27 }
 0x9b2   :  { %v1007_v61 = vpop.f32.mrf.mxu2 }
 0x9b3   :  { %v1037_v59 = vadd.f32 %v1036_v58, %v1007_v61 }
 0x9ba   :  { %v1010_v56 = vpop.f32.mrf.mxu2 }
 0x9bb   :  { %v1040_v8 = vadd.f32 %v1039_v4, %v1010_v56 }
 0x9c2   :  { %v1067_v60 = vpop.f32.mrf.mxu2 }
 0x9c3   :  { %v1073_v63 = vadd.f32 %v1067_v60, %v1037_v59 }
 0x9c5   :  { %v1075_v1 = vmul.f32 %v2359_v6, %v1073_v63 }
 0x9c7   :  { %1077 = vst [vmem:[#allocation2 + $0x18] sm:$0xff] %v1075_v1  ;;  %1090 = vadd.xlane.f32.xlu0 %v1075_v1 }
 0x9ca   :  { %v1070_v10 = vpop.f32.mrf.mxu2 }
 0x9cb   :  { %v1074_v11 = vadd.f32 %v1070_v10, %v1040_v8  ;;  %v1132_v8 = vld [vmem:[%s2593_s20 + $0x18] sm:$0xff] }
 0x9cd   :  { %v1076_v14 = vmul.f32 %v2359_v6, %v1074_v11 }
 0x9cf   :  { %1078 = vst [vmem:[#allocation2 + $0x20] sm:$0xff] %v1076_v14  ;;  %1084 = vadd.xlane.f32.xlu0 %v1079_v12  ;;  %1092 = vadd.xlane.f32.xlu2 %v1076_v14 }
 0x9d7   :  { %1118 = vadd.xlane.f32.xlu0 %v1111_v7  ;;  %1086 = vadd.xlane.f32.xlu2 %v2161_v34 }
 0xa3a   :  { %v1091_v15 = vpop.xlane.xlu0 %1090 }
 0xa3b   :  { %v1097_v18 = vmul.f32 0.03125, %v1091_v15 }
 0xa3d   :  { %v1102_v19 = vsub.f32 %v1075_v1, %v1097_v18 }
 0xa3f   :  { %v2371_v20 = vmul.f32 %v2359_v6, %v1102_v19 }
 0xa41   :  { %v1112_v40 = vmul.f32 %v2371_v20, %v2371_v20 }
 0xa42   :  { %v1085_v21 = vpop.xlane.xlu0 %1084  ;;  %v1093_v22 = vpop.xlane.xlu2 %1092 }
 0xa43   :  { %v1094_v23 = vmul.f32 0.03125, %v1085_v21  ;;  %v1098_v17 = vmul.f32 0.03125, %v1093_v22  ;;  %1120 = vadd.xlane.f32.xlu2 %v1112_v40 }
 0xa45   :  { %v1099_v24 = vsub.f32 %v1079_v12, %v1094_v23  ;;  %v1103_v25 = vsub.f32 %v1076_v14, %v1098_v17  ;;  %v1133_v23 = vld [vmem:[%s2593_s20 + $0x20] sm:$0xff] }
 0xa47   :  { %v2376_v26 = vmul.f32 %v2359_v6, %v1099_v24  ;;  %v2379_v28 = vmul.f32 %v2359_v6, %v1103_v25 }
 0xa49   :  { %v1109_v29 = vmul.f32 %v2376_v26, %v2376_v26  ;;  %v1113_v16 = vmul.f32 %v2379_v28, %v2379_v28 }
 0xa4a   :  { %v1119_v33 = vpop.xlane.xlu0 %1118  ;;  %v1087_v30 = vpop.xlane.xlu2 %1086 }
 0xa4b   :  { %v1126_v31 = vmul.f32 0.03125, %v1119_v33  ;;  %v1095_v32 = vmul.f32 0.03125, %v1087_v30  ;;  %1114 = vadd.xlane.f32.xlu2 %v1109_v29  ;;  %1122 = vadd.xlane.f32.xlu1 %v1113_v16  ;;  %v1224_v29 = vld [vmem:[%s2594_s21] sm:$0xff] }
 0xa4d   :  { %v1136_v35 = vadd.f32 1e-05, %v1126_v31  ;;  %v1100_v36 = vsub.f32 %v2161_v34, %v1095_v32  ;;  %v1130_v32 = vld [vmem:[%s2593_s20 + $0x8] sm:$0xff] }
 0xa4f   :  { %1783 = vrsqrt.f32 %v1136_v35  ;;  %v2387_v37 = vmul.f32 %v2359_v6, %v1100_v36  ;;  %vm1165_vm5 = vweird.f32 %v1136_v35  ;;  %v1129_v36 = vld [vmem:[%s2593_s20] sm:$0xff] }
 0xa51   :  { %v1110_v38 = vmul.f32 %v2387_v37, %v2387_v37 }
 0xa53   :  { %1116 = vadd.xlane.f32.xlu1 %v1110_v38 }
 0xa55   :  { %v1784_v39 = vpop.eup %1783 }
 0xa56   :  { %v1160_v41 = vmul.f32 %v1784_v39, %v1136_v35  ;;  %vm1166_vm4 = vweird.f32 %v1784_v39 }
 0xa57   :  { %vm1167_vm7 = vmor %vm1165_vm5, %vm1166_vm4  ;;  %vm1275_vm4 = vcmask 326656  }
 0xa58   :  { %v1161_v3 = vmul.f32 %v1784_v39, %v1160_v41 }
 0xa5a   :  { %v1162_v42 = vmul.f32 0.5, %v1161_v3 }
 0xa5c   :  { %v1163_v44 = vsub.f32 1.5, %v1162_v42  ;;  %v1225_v42 = vld [vmem:[%s2594_s21 + $0x8] sm:$0xff] }
 0xa5e   :  { %v1164_v34 = vmul.f32 %v1784_v39, %v1163_v44 }
 0xa60   :  { %v1168_v48 = vsel %vm1167_vm7, %v1784_v39, %v1164_v34 }
 0xa61   :  { %v1191_v47 = vmul.f32 %v1168_v48, %v1131_v62 }
 0xa63   :  { %1206 = vperm.xlu0 %1747, %v1191_v47   ;;  %1251 = vperm.xlu2 %1746, %v1228_v46  }
 0xa6b   :  { %1246 = vperm.xlu0 %1747, %v1227_v49  }
 0xa6c   :  { %1241 = vperm.xlu1 %1745, %v1226_v55  }
 0xab6   :  { %v1121_v50 = vpop.xlane.xlu2 %1120 }
 0xab7   :  { %v1127_v51 = vmul.f32 0.03125, %v1121_v50 }
 0xab9   :  { %v1137_v9 = vadd.f32 1e-05, %v1127_v51 }
 0xabb   :  { %1785 = vrsqrt.f32 %v1137_v9  ;;  %vm1175_vm9 = vweird.f32 %v1137_v9 }
 0xabe   :  { %v1123_v53 = vpop.xlane.xlu1 %1122  ;;  %v1115_v43 = vpop.xlane.xlu2 %1114 }
 0xabf   :  { %v1128_v52 = vmul.f32 0.03125, %v1123_v53  ;;  %v1124_v45 = vmul.f32 0.03125, %v1115_v43 }
 0xac1   :  { %v1786_v54 = vpop.eup %1785  ;;  %v1138_v0 = vadd.f32 1e-05, %v1128_v52  ;;  %v1134_v57 = vadd.f32 1e-05, %v1124_v45 }
 0xac2   :  { %v1170_v61 = vmul.f32 %v1786_v54, %v1137_v9  ;;  %vm1176_vm8 = vweird.f32 %v1786_v54 }
 0xac3   :  { %1787 = vrsqrt.f32 %v1138_v0  ;;  %vm1177_vm10 = vmor %vm1175_vm9, %vm1176_vm8  ;;  %vm1185_vm12 = vweird.f32 %v1138_v0  ;;  %vm1145_vm14 = vweird.f32 %v1134_v57 }
 0xac4   :  { %v1171_v56 = vmul.f32 %v1786_v54, %v1170_v61  ;;  %1789 = vrsqrt.f32 %v1134_v57 }
 0xac6   :  { %v1172_v58 = vmul.f32 0.5, %v1171_v56  ;;  %v1117_v59 = vpop.xlane.xlu1 %1116  ;;  %v1252_v62 = vpop.permute.xlu2 %1251 }
 0xac7   :  { %v1125_v60 = vmul.f32 0.03125, %v1117_v59 }
 0xac8   :  { %v1173_v63 = vsub.f32 1.5, %v1172_v58 }
 0xac9   :  { %v1788_v1 = vpop.eup %1787  ;;  %v1135_v2 = vadd.f32 1e-05, %v1125_v60 }
 0xaca   :  { %v1790_v4 = vpop.eup %1789  ;;  %v1180_v5 = vmul.f32 %v1788_v1, %v1138_v0  ;;  %v1174_v10 = vmul.f32 %v1786_v54, %v1173_v63  ;;  %vm1186_vm11 = vweird.f32 %v1788_v1 }
 0xacb   :  { %v1140_v11 = vmul.f32 %v1790_v4, %v1134_v57  ;;  %1791 = vrsqrt.f32 %v1135_v2  ;;  %vm1187_vm13 = vmor %vm1185_vm12, %vm1186_vm11  ;;  %vm1146_vm15 = vweird.f32 %v1790_v4  ;;  %vm1155_vm2 = vweird.f32 %v1135_v2 }
 0xacc   :  { %v1181_v12 = vmul.f32 %v1788_v1, %v1180_v5  ;;  %v1178_v13 = vsel %vm1177_vm10, %v1786_v54, %v1174_v10  ;;  %vm1147_vm1 = vmor %vm1145_vm14, %vm1146_vm15  ;;  %v1271_v5 = vld [vmem:[%s2595_s22 + $0x10] sm:$0xff]  ;;  %v1273_v10 = vld [vmem:[%s2595_s22 + $0x20] sm:$0xff] }
 0xacd   :  { %v1141_v14 = vmul.f32 %v1790_v4, %v1140_v11  ;;  %v1192_v7 = vmul.f32 %v1178_v13, %v1132_v8  ;;  %v1272_v8 = vld [vmem:[%s2595_s22 + $0x18] sm:$0xff]  ;;  %v1274_v11 = vld [vmem:[%s2595_s22 + $0x28] sm:$0xff] }
 0xace   :  { %v1182_v15 = vmul.f32 0.5, %v1181_v12 }
 0xacf   :  { %v1142_v18 = vmul.f32 0.5, %v1141_v14  ;;  %1211 = vperm.xlu1 %1745, %v1192_v7  }
 0xad0   :  { %v1183_v19 = vsub.f32 1.5, %v1182_v15 }
 0xad1   :  { %v1792_v40 = vpop.eup %1791  ;;  %v1143_v21 = vsub.f32 1.5, %v1142_v18 }
 0xad2   :  { %v1150_v22 = vmul.f32 %v1792_v40, %v1135_v2  ;;  %v1184_v17 = vmul.f32 %v1788_v1, %v1183_v19  ;;  %vm1156_vm0 = vweird.f32 %v1792_v40 }
 0xad3   :  { %v1144_v30 = vmul.f32 %v1790_v4, %v1143_v21  ;;  %vm1157_vm3 = vmor %vm1155_vm2, %vm1156_vm0 }
 0xad4   :  { %v1151_v24 = vmul.f32 %v1792_v40, %v1150_v22  ;;  %v1188_v25 = vsel %vm1187_vm13, %v1788_v1, %v1184_v17 }
 0xad5   :  { %v1193_v16 = vmul.f32 %v1188_v25, %v1133_v23  ;;  %v1148_v38 = vsel %vm1147_vm1, %v1790_v4, %v1144_v30  ;;  %v1207_v44 = vpop.permute.xlu0 %1206  ;;  %v1269_v4 = vld [vmem:[%s2595_s22] sm:$0xff] }
 0xad6   :  { %v1152_v33 = vmul.f32 0.5, %v1151_v24  ;;  %v1189_v3 = vmul.f32 %v1148_v38, %v1129_v36  ;;  %v1221_v50 = vmul.f32 %v1207_v44, %v2365_v27 }
 0xad7   :  { %1216 = vperm.xlu0 %1747, %v1193_v16   ;;  %1231 = vperm.xlu1 %1745, %v1224_v29  }
 0xad8   :  { %v1153_v31 = vsub.f32 1.5, %v1152_v33 }
 0xada   :  { %v1154_v35 = vmul.f32 %v1792_v40, %v1153_v31 }
 0xadc   :  { %v1158_v39 = vsel %vm1157_vm3, %v1792_v40, %v1154_v35 }
 0xadd   :  { %v1190_v41 = vmul.f32 %v1158_v39, %v1130_v32  ;;  %v1247_v48 = vpop.permute.xlu0 %1246 }
 0xade   :  { %v1242_v34 = vpop.permute.xlu1 %1241 }
 0xadf   :  { %1201 = vperm.xlu2 %1746, %v1190_v41   ;;  %1196 = vperm.xlu0 %1747, %v1189_v3   ;;  %v1256_v43 = vadd.f32 %v1242_v34, %v1221_v50 }
 0xae1   :  { %v1261_v61 = vmax.f32 %v1256_v43, 0.0 }
 0xae3   :  { %v1266_v60 = vmul.f32 %v2359_v6, %v1261_v61 }
 0xae7   :  { %1236 = vperm.xlu2 %1746, %v1225_v42  }
 0xb39   :  { %v1202_v46 = vpop.permute.xlu2 %1201 }
 0xb3a   :  { %v1220_v52 = vmul.f32 %v1202_v46, %v2387_v37 }
 0xb41   :  { %v1212_v47 = vpop.permute.xlu1 %1211  ;;  %v1237_v53 = vpop.permute.xlu2 %1236 }
 0xb42   :  { %v1222_v49 = vmul.f32 %v1212_v47, %v2371_v20  ;;  %v1255_v0 = vadd.f32 %v1237_v53, %v1220_v52 }
 0xb44   :  { %v1257_v51 = vadd.f32 %v1247_v48, %v1222_v49  ;;  %v1260_v59 = vmax.f32 %v1255_v0, 0.0 }
 0xb46   :  { %v1262_v54 = vmax.f32 %v1257_v51, 0.0  ;;  %v1265_v37 = vmul.f32 %v2359_v6, %v1260_v59  ;;  %v1502_v51 = vld [vmem:[%s2597_s24 + $0x28] sm:$0xff] }
 0xb48   :  { %v1267_v27 = vmul.f32 %v2359_v6, %v1262_v54 }
 0xb49   :  { %v1217_v55 = vpop.permute.xlu0 %1216 }
 0xb4a   :  { %v1223_v9 = vmul.f32 %v1217_v55, %v2379_v28  ;;  %v1232_v28 = vpop.permute.xlu1 %1231 }
 0xb4c   :  { %v1258_v45 = vadd.f32 %v1252_v62, %v1223_v9  ;;  %v1501_v9 = vld [vmem:[%s2597_s24 + $0x20] sm:$0xff] }
 0xb4e   :  { %v1263_v57 = vmax.f32 %v1258_v45, 0.0 }
 0xb50   :  { %v1268_v56 = vmul.f32 %v2359_v6, %v1263_v57 }
 0xb51   :  { %v1197_v58 = vpop.permute.xlu0 %1196 }
 0xb52   :  { %v1219_v20 = vmul.f32 %v1197_v58, %v2376_v26  ;;  %1305 = vmatpush.msra.mxu1 %v1268_v56  ;;  %1734 = vmatpush.msra.mxu3 %v1268_v56  ;;  %v1270_v26 = vld [vmem:[%s2595_s22 + $0x8] sm:$0xff] }
 0xb54   :  { %v1254_v63 = vadd.f32 %v1232_v28, %v1219_v20  ;;  %1306 = vmatpush.msra.mxu1 %v1267_v27  ;;  %1735 = vmatpush.msra.mxu3 %v1267_v27 }
 0xb56   :  { %v1259_v1 = vmax.f32 %v1254_v63, 0.0  ;;  %1307 = vmatpush.msra.mxu1 %v1266_v60  ;;  %1736 = vmatpush.msra.mxu3 %v1266_v60 }
 0xb58   :  { %1308 = vmatpush.msra.mxu1 %v1265_v37  ;;  %1737 = vmatpush.msra.mxu3 %v1265_v37  ;;  %v1264_v2 = vmul.f32 %v2359_v6, %v1259_v1 }
 0xb5a   :  { %1309 = vmatpush.msra.mxu1 %v1264_v2  ;;  %1738 = vmatpush.msra.mxu3 %v1264_v2 }
 0xb5b   :  { %1723 = vmatmul.msk.f32.vlgmr.msra.gmra.mxu3 %vm1275_vm4, %v1270_v26  ;;  %1722 = vmatmul.msk.f32.vlgmr.msra.gmra.mxu1 %vm1275_vm4, %v1269_v4 }
 0xb63   :  { %1724 = vmatmul.msk.f32.gmra.mxu3 %vm1275_vm4, %v1271_v5 }
 0xb6b   :  { %1725 = vmatmul.msk.f32.gmra.mxu3 %vm1275_vm4, %v1272_v8  ;;  %v1386_v8 = vld [vmem:[%s2596_s23 + $0x18] sm:$0xff] }
 0xb73   :  { %1726 = vmatmul.msk.f32.gmra.mxu3 %vm1275_vm4, %v1273_v10 }
 0xb7b   :  { %1727 = vmatmul.msk.f32.gmra.mxu3 %vm1275_vm4, %v1274_v11 }
 0xbd8   :  { %v1311_v7 = vpop.f32.mrf.mxu1 }
 0xbde   :  { %v1314_v12 = vpop.f32.mrf.mxu3 }
 0xbe6   :  { %v1317_v13 = vpop.f32.mrf.mxu3 }
 0xbee   :  { %v1320_v14 = vpop.f32.mrf.mxu3 }
 0xbef   :  { %1335 = vadd.xlane.f32.xlu1 %v1320_v14 }
 0xbf6   :  { %v1323_v15 = vpop.f32.mrf.mxu3 }
 0xbf7   :  { %1337 = vadd.xlane.f32.xlu2 %v1323_v15  ;;  %1329 = vadd.xlane.f32.xlu1 %v1311_v7 }
 0xbfe   :  { %v1326_v18 = vpop.f32.mrf.mxu3 }
 0xbff   :  { %1331 = vadd.xlane.f32.xlu2 %v1314_v12  ;;  %1339 = vadd.xlane.f32.xlu0 %v1326_v18 }
 0xc07   :  { %1333 = vadd.xlane.f32.xlu0 %v1317_v13 }
 0xc62   :  { %v1336_v19 = vpop.xlane.xlu1 %1335 }
 0xc63   :  { %v1344_v40 = vmul.f32 0.03125, %v1336_v19 }
 0xc65   :  { %v1350_v21 = vsub.f32 %v1320_v14, %v1344_v40 }
 0xc67   :  { %v2450_v22 = vmul.f32 %v2359_v6, %v1350_v21 }
 0xc69   :  { %v1362_v23 = vmul.f32 %v2450_v22, %v2450_v22 }
 0xc6a   :  { %v1338_v17 = vpop.xlane.xlu2 %1337  ;;  %v1330_v24 = vpop.xlane.xlu1 %1329 }
 0xc6b   :  { %v1345_v25 = vmul.f32 0.03125, %v1338_v17  ;;  %v1341_v29 = vmul.f32 0.03125, %v1330_v24  ;;  %1371 = vadd.xlane.f32.xlu1 %v1362_v23  ;;  %v1387_v17 = vld [vmem:[%s2596_s23 + $0x20] sm:$0xff] }
 0xc6d   :  { %v1351_v16 = vsub.f32 %v1323_v15, %v1345_v25  ;;  %v1347_v33 = vsub.f32 %v1311_v7, %v1341_v29 }
 0xc6f   :  { %v2455_v30 = vmul.f32 %v2359_v6, %v1351_v16  ;;  %v2458_v31 = vmul.f32 %v2359_v6, %v1347_v33 }
 0xc71   :  { %v1363_v32 = vmul.f32 %v2455_v30, %v2455_v30  ;;  %v1359_v35 = vmul.f32 %v2458_v31, %v2458_v31 }
 0xc72   :  { %v1332_v36 = vpop.xlane.xlu2 %1331  ;;  %v1340_v38 = vpop.xlane.xlu0 %1339 }
 0xc73   :  { %v1342_v39 = vmul.f32 0.03125, %v1332_v36  ;;  %v1346_v41 = vmul.f32 0.03125, %v1340_v38  ;;  %1373 = vadd.xlane.f32.xlu2 %v1363_v32  ;;  %1365 = vadd.xlane.f32.xlu1 %v1359_v35 }
 0xc75   :  { %v1348_v3 = vsub.f32 %v1314_v12, %v1342_v39  ;;  %v1352_v42 = vsub.f32 %v1326_v18, %v1346_v41 }
 0xc77   :  { %v2465_v44 = vmul.f32 %v2359_v6, %v1348_v3  ;;  %v2468_v62 = vmul.f32 %v2359_v6, %v1352_v42 }
 0xc79   :  { %v1360_v34 = vmul.f32 %v2465_v44, %v2465_v44  ;;  %v1364_v48 = vmul.f32 %v2468_v62, %v2468_v62 }
 0xc7a   :  { %v1334_v46 = vpop.xlane.xlu0 %1333 }
 0xc7b   :  { %v1343_v47 = vmul.f32 0.03125, %v1334_v46  ;;  %1367 = vadd.xlane.f32.xlu2 %v1360_v34  ;;  %1375 = vadd.xlane.f32.xlu0 %v1364_v48  ;;  %v1384_v48 = vld [vmem:[%s2596_s23 + $0x8] sm:$0xff] }
 0xc7d   :  { %v1349_v49 = vsub.f32 %v1317_v13, %v1343_v47 }
 0xc7f   :  { %v2475_v55 = vmul.f32 %v2359_v6, %v1349_v49  ;;  %v1388_v49 = vld [vmem:[%s2596_s23 + $0x28] sm:$0xff] }
 0xc81   :  { %v1361_v50 = vmul.f32 %v2475_v55, %v2475_v55 }
 0xc83   :  { %1369 = vadd.xlane.f32.xlu0 %v1361_v50 }
 0xc8c   :  { %1530 = vperm.xlu1 %1745, %v1502_v51  }
 0xc93   :  { %1525 = vperm.xlu2 %1746, %v1501_v9  }
 0xcde   :  { %v1372_v53 = vpop.xlane.xlu1 %1371 }
 0xcdf   :  { %v1380_v43 = vmul.f32 0.03125, %v1372_v53 }
 0xce1   :  { %v1392_v52 = vadd.f32 1e-05, %v1380_v43 }
 0xce3   :  { %1793 = vrsqrt.f32 %v1392_v52  ;;  %vm1431_vm7 = vweird.f32 %v1392_v52 }
 0xce6   :  { %v1374_v45 = vpop.xlane.xlu2 %1373  ;;  %v1366_v56 = vpop.xlane.xlu1 %1365 }
 0xce7   :  { %v1381_v54 = vmul.f32 0.03125, %v1374_v45  ;;  %v1377_v20 = vmul.f32 0.03125, %v1366_v56 }
 0xce9   :  { %v1794_v0 = vpop.eup %1793  ;;  %v1393_v57 = vadd.f32 1e-05, %v1381_v54  ;;  %v2485_v5 = vadd.f32 1e-05, %v1377_v20 }
 0xcea   :  { %v1426_v61 = vmul.f32 %v1794_v0, %v1392_v52  ;;  %vm1432_vm5 = vweird.f32 %v1794_v0 }
 0xceb   :  { %1795 = vrsqrt.f32 %v1393_v57  ;;  %vm1433_vm8 = vmor %vm1431_vm7, %vm1432_vm5  ;;  %vm1441_vm10 = vweird.f32 %v1393_v57  ;;  %vm1401_vm7 = vweird.f32 %v2485_v5 }
 0xcec   :  { %v1427_v58 = vmul.f32 %v1794_v0, %v1426_v61 }
 0xcee   :  { %v1428_v59 = vmul.f32 0.5, %v1427_v58  ;;  %v1368_v27 = vpop.xlane.xlu2 %1367  ;;  %v1376_v28 = vpop.xlane.xlu0 %1375  ;;  %v1498_v58 = vld [vmem:[%s2597_s24 + $0x8] sm:$0xff] }
 0xcef   :  { %v1378_v60 = vmul.f32 0.03125, %v1368_v27  ;;  %v1382_v63 = vmul.f32 0.03125, %v1376_v28  ;;  %v1500_v27 = vld [vmem:[%s2597_s24 + $0x18] sm:$0xff] }
 0xcf0   :  { %v1429_v37 = vsub.f32 1.5, %v1428_v59 }
 0xcf1   :  { %v1796_v1 = vpop.eup %1795  ;;  %v1390_v2 = vadd.f32 1e-05, %v1378_v60  ;;  %v1394_v26 = vadd.f32 1e-05, %v1382_v63  ;;  %v1383_v60 = vld [vmem:[%s2596_s23] sm:$0xff] }
 0xcf2   :  { %v1436_v4 = vmul.f32 %v1796_v1, %v1393_v57  ;;  %v1430_v10 = vmul.f32 %v1794_v0, %v1429_v37  ;;  %vm1442_vm9 = vweird.f32 %v1796_v1  ;;  %v1385_v57 = vld [vmem:[%s2596_s23 + $0x10] sm:$0xff] }
 0xcf3   :  { %1797 = vrsqrt.f32 %v1390_v2  ;;  %vm1443_vm11 = vmor %vm1441_vm10, %vm1442_vm9  ;;  %vm1411_vm14 = vweird.f32 %v1390_v2  ;;  %vm1451_vm0 = vweird.f32 %v1394_v26  ;;  %v1499_v37 = vld [vmem:[%s2597_s24 + $0x10] sm:$0xff] }
 0xcf4   :  { %v1437_v11 = vmul.f32 %v1796_v1, %v1436_v4  ;;  %1799 = vrsqrt.f32 %v1394_v26  ;;  %v1434_v12 = vsel %vm1433_vm8, %v1794_v0, %v1430_v10 }
 0xcf5   :  { %v1458_v13 = vmul.f32 %v1434_v12, %v1386_v8  ;;  %1801 = vrsqrt.f32 %v2485_v5 }
 0xcf6   :  { %v1438_v14 = vmul.f32 0.5, %v1437_v11  ;;  %v1370_v7 = vpop.xlane.xlu0 %1369 }
 0xcf7   :  { %v1379_v15 = vmul.f32 0.03125, %v1370_v7  ;;  %1478 = vperm.xlu0 %1747, %v1458_v13  }
 0xcf8   :  { %v1439_v18 = vsub.f32 1.5, %v1438_v14 }
 0xcf9   :  { %v1798_v19 = vpop.eup %1797  ;;  %v1391_v40 = vadd.f32 1e-05, %v1379_v15 }
 0xcfa   :  { %v1800_v21 = vpop.eup %1799  ;;  %v1406_v23 = vmul.f32 %v1798_v19, %v1390_v2  ;;  %v1440_v24 = vmul.f32 %v1796_v1, %v1439_v18  ;;  %vm1412_vm12 = vweird.f32 %v1798_v19  ;;  %v1497_v2 = vld [vmem:[%s2597_s24] sm:$0xff] }
 0xcfb   :  { %v1446_v25 = vmul.f32 %v1800_v21, %v1394_v26  ;;  %1803 = vrsqrt.f32 %v1391_v40  ;;  %v1802_v29 = vpop.eup %1801  ;;  %vm1452_vm13 = vweird.f32 %v1800_v21  ;;  %vm1413_vm15 = vmor %vm1411_vm14, %vm1412_vm12  ;;  %vm1421_vm3 = vweird.f32 %v1391_v40  ;;  %v1526_v26 = vpop.permute.xlu2 %1525 }
 0xcfc   :  { %v1407_v16 = vmul.f32 %v1798_v19, %v1406_v23  ;;  %v1444_v33 = vsel %vm1443_vm11, %v1796_v1, %v1440_v24  ;;  %v1396_v38 = vmul.f32 %v1802_v29, %v2485_v5  ;;  %vm1453_vm1 = vmor %vm1451_vm0, %vm1452_vm13  ;;  %vm1402_vm5 = vweird.f32 %v1802_v29 }
 0xcfd   :  { %v1447_v32 = vmul.f32 %v1800_v21, %v1446_v25  ;;  %v1459_v35 = vmul.f32 %v1444_v33, %v1387_v17  ;;  %vm1403_vm8 = vmor %vm1401_vm7, %vm1402_vm5 }
 0xcfe   :  { %v1408_v36 = vmul.f32 0.5, %v1407_v16  ;;  %v1397_v47 = vmul.f32 %v1802_v29, %v1396_v38  ;;  %v1531_v18 = vpop.permute.xlu1 %1530 }
 0xcff   :  { %v1448_v39 = vmul.f32 0.5, %v1447_v32  ;;  %1483 = vperm.xlu2 %1746, %v1459_v35  }
 0xd00   :  { %v1409_v41 = vsub.f32 1.5, %v1408_v36  ;;  %v1398_v54 = vmul.f32 0.5, %v1397_v47 }
 0xd01   :  { %v1804_v3 = vpop.eup %1803  ;;  %v1449_v42 = vsub.f32 1.5, %v1448_v39 }
 0xd02   :  { %v1416_v34 = vmul.f32 %v1804_v3, %v1391_v40  ;;  %v1410_v46 = vmul.f32 %v1798_v19, %v1409_v41  ;;  %vm1422_vm2 = vweird.f32 %v1804_v3  ;;  %v1399_v56 = vsub.f32 1.5, %v1398_v54 }
 0xd03   :  { %v1450_v50 = vmul.f32 %v1800_v21, %v1449_v42  ;;  %vm1423_vm4 = vmor %vm1421_vm3, %vm1422_vm2 }
 0xd04   :  { %v1417_v51 = vmul.f32 %v1804_v3, %v1416_v34  ;;  %v1414_v9 = vsel %vm1413_vm15, %v1798_v19, %v1410_v46  ;;  %v1400_v28 = vmul.f32 %v1802_v29, %v1399_v56 }
 0xd05   :  { %v1456_v53 = vmul.f32 %v1414_v9, %v1384_v48  ;;  %v1454_v43 = vsel %vm1453_vm1, %v1800_v21, %v1450_v50 }
 0xd06   :  { %v1418_v52 = vmul.f32 0.5, %v1417_v51  ;;  %v1460_v45 = vmul.f32 %v1454_v43, %v1388_v49  ;;  %v1404_v63 = vsel %vm1403_vm8, %v1802_v29, %v1400_v28 }
 0xd07   :  { %1468 = vperm.xlu2 %1746, %v1456_v53   ;;  %v1455_v1 = vmul.f32 %v1404_v63, %v1383_v60 }
 0xd08   :  { %v1419_v0 = vsub.f32 1.5, %v1418_v52  ;;  %1488 = vperm.xlu0 %1747, %v1460_v45   ;;  %v1807_v52 = vld [vmem:[%s2632_s4] ss:$0 sm:$0xff] }
 0xd0a   :  { %v1420_v61 = vmul.f32 %v1804_v3, %v1419_v0  ;;  %v1583_v0 = vld [vmem:[%s2598_s25] sm:$0xff] }
 0xd0c   :  { %v1424_v59 = vsel %vm1423_vm4, %v1804_v3, %v1420_v61  ;;  %v1806_v3 = vld [vmem:[%s2634_s29] ss:$0 sm:$0xff] }
 0xd0d   :  { %v1457_v20 = vmul.f32 %v1424_v59, %v1385_v57 }
 0xd0f   :  { %1510 = vperm.xlu2 %1746, %v1498_v58   ;;  %1473 = vperm.xlu1 %1745, %v1457_v20  }
 0xd10   :  { %1520 = vperm.xlu0 %1747, %v1500_v27   ;;  %v1584_v27 = vld [vmem:[%s2598_s25 + $0x8] sm:$0xff]  ;;  %s1837_s25 = smov [#allocation2]  }
 0xd11   :  { %s1684_s13 = sshll.u32 %s1837_s25, 4  ;;  %s1685_s13 = int_to_ptr.vmem [resolvable:$true] %s1684_s13 }
 0xd17   :  { %1515 = vperm.xlu1 %1745, %v1499_v37   ;;  %v1643_v37 = vld [vmem:[%s2600_s27] sm:$0xff] }
 0xd18   :  { %1463 = vperm.xlu0 %1747, %v1455_v1   ;;  %v1644_v1 = vld [vmem:[%s2600_s27 + $0x8] sm:$0xff]  ;;  %s1838_s27 = smov 128  }
 0xd1f   :  { %1505 = vperm.xlu1 %1745, %v1497_v2  }
 0xd59   :  { %v1484_v4 = vpop.permute.xlu2 %1483 }
 0xd5a   :  { %v1495_v5 = vmul.f32 %v1484_v4, %v2455_v30 }
 0xd5c   :  { %v1537_v8 = vadd.f32 %v1526_v26, %v1495_v5 }
 0xd5e   :  { %v1543_v10 = vmax.f32 %v1537_v8, 0.0 }
 0xd60   :  { %1553 = vrot.lane.b32.xlu2 %v1543_v10, %s1836_s1 }
 0xd61   :  { %v1469_v11 = vpop.permute.xlu2 %1468 }
 0xd62   :  { %v1492_v12 = vmul.f32 %v1469_v11, %v2465_v44 }
 0xd69   :  { %v1511_v13 = vpop.permute.xlu2 %1510  ;;  %v1479_v15 = vpop.permute.xlu0 %1478 }
 0xd6a   :  { %v1534_v14 = vadd.f32 %v1511_v13, %v1492_v12  ;;  %v1494_v23 = vmul.f32 %v1479_v15, %v2450_v22 }
 0xd6c   :  { %v1540_v7 = vmax.f32 %v1534_v14, 0.0 }
 0xd6e   :  { %1547 = vrot.lane.b32.xlu2 %v1540_v7, %s1836_s1 }
 0xd76   :  { %1571 = vrot.lane.b32.xlu2 %v1543_v10, %s1835_s30 }
 0xd7a   :  { %v1489_v19 = vpop.permute.xlu0 %1488 }
 0xd7b   :  { %v1496_v40 = vmul.f32 %v1489_v19, %v2468_v62 }
 0xd7d   :  { %v1538_v30 = vadd.f32 %v1531_v18, %v1496_v40 }
 0xd7e   :  { %1565 = vrot.lane.b32.xlu2 %v1540_v7, %s1835_s30 }
 0xd7f   :  { %v1544_v21 = vmax.f32 %v1538_v30, 0.0 }
 0xd81   :  { %1555 = vrot.lane.b32.xlu0 %v1544_v21, %s1836_s1  ;;  %1630 = vmatpush.msrb.mxu2 %v1544_v21  ;;  %v1474_v44 = vpop.permute.xlu1 %1473 }
 0xd82   :  { %v1521_v17 = vpop.permute.xlu0 %1520  ;;  %v1493_v29 = vmul.f32 %v1474_v44, %v2475_v55  ;;  %v1581_v55 = vld [vmem:[%s2599_s26] sm:$0xff] }
 0xd83   :  { %v1536_v24 = vadd.f32 %v1521_v17, %v1494_v23  ;;  %1631 = vmatpush.msrb.mxu2 %v1543_v10 }
 0xd85   :  { %v1542_v25 = vmax.f32 %v1536_v24, 0.0 }
 0xd87   :  { %1551 = vrot.lane.b32.xlu1 %v1542_v25, %s1836_s1  ;;  %1632 = vmatpush.msrb.mxu2 %v1542_v25 }
 0xd89   :  { %v1516_v62 = vpop.permute.xlu1 %1515 }
 0xd8a   :  { %v1535_v16 = vadd.f32 %v1516_v62, %v1493_v29  ;;  %v1464_v32 = vpop.permute.xlu0 %1463 }
 0xd8b   :  { %v1491_v22 = vmul.f32 %v1464_v32, %v2458_v31  ;;  %v1582_v31 = vld [vmem:[%s2599_s26 + $0x8] sm:$0xff] }
 0xd8c   :  { %v1541_v33 = vmax.f32 %v1535_v16, 0.0 }
 0xd8e   :  { %1549 = vrot.lane.b32.xlu0 %v1541_v33, %s1836_s1  ;;  %1633 = vmatpush.msrb.mxu2 %v1541_v33 }
 0xd90   :  { %1634 = vmatpush.msrb.mxu2 %v1540_v7 }
 0xd91   :  { %v1506_v35 = vpop.permute.xlu1 %1505 }
 0xd92   :  { %v1533_v36 = vadd.f32 %v1506_v35, %v1491_v22 }
 0xd94   :  { %v1539_v38 = vmax.f32 %v1533_v36, 0.0 }
 0xd96   :  { %1573 = vrot.lane.b32.xlu0 %v1544_v21, %s1835_s30  ;;  %1545 = vrot.lane.b32.xlu1 %v1539_v38, %s1836_s1 }
 0xd97   :  { %1635 = vmatpush.msrb.mxu2 %v1539_v38 }
 0xd98   :  { %1730 = vmatmul.msk.f32.vlgmr.msrb.gmra.mxu2 %vm458_vm6, %v1581_v55 }
 0xd9e   :  { %1567 = vrot.lane.b32.xlu0 %v1541_v33, %s1835_s30  ;;  %1569 = vrot.lane.b32.xlu1 %v1542_v25, %s1835_s30 }
 0xda0   :  { %1731 = vmatmul.msk.f32.gmra.mxu2 %vm458_vm6, %v1582_v31 }
 0xda6   :  { %1563 = vrot.lane.b32.xlu1 %v1539_v38, %s1835_s30 }
 0xdba   :  { %v1554_v39 = vpop.permute.xlu2 %1553 }
 0xdbb   :  { %v1561_v34 = vmul.f32 %v1806_v3, %v1554_v39 }
 0xdc8   :  { %v1548_v47 = vpop.permute.xlu2 %1547 }
 0xdc9   :  { %v1558_v51 = vmul.f32 %v1806_v3, %v1548_v47 }
 0xdd0   :  { %v1572_v9 = vpop.permute.xlu2 %1571 }
 0xdd1   :  { %v1579_v57 = vmul.f32 %v1807_v52, %v1572_v9 }
 0xdd8   :  { %v1566_v59 = vpop.permute.xlu2 %1565 }
 0xdd9   :  { %v1576_v28 = vmul.f32 %v1807_v52, %v1566_v59 }
 0xdf3   :  { %v1556_v41 = vpop.permute.xlu0 %1555 }
 0xdf4   :  { %v1562_v42 = vmul.f32 %v1806_v3, %v1556_v41 }
 0xdf6   :  { %1601 = vmatpush.msrb.mxu0 %v1562_v42 }
 0xdf8   :  { %1602 = vmatpush.msrb.mxu0 %v1561_v34 }
 0xdf9   :  { %v1552_v48 = vpop.permute.xlu1 %1551 }
 0xdfa   :  { %v1560_v46 = vmul.f32 %v1806_v3, %v1552_v48 }
 0xdfc   :  { %1603 = vmatpush.msrb.mxu0 %v1560_v46 }
 0xe00   :  { %v1550_v49 = vpop.permute.xlu0 %1549 }
 0xe01   :  { %v1559_v50 = vmul.f32 %v1806_v3, %v1550_v49 }
 0xe03   :  { %1604 = vmatpush.msrb.mxu0 %v1559_v50 }
 0xe05   :  { %1605 = vmatpush.msrb.mxu0 %v1558_v51 }
 0xe08   :  { %v1574_v53 = vpop.permute.xlu0 %1573  ;;  %v1546_v43 = vpop.permute.xlu1 %1545 }
 0xe09   :  { %v1580_v45 = vmul.f32 %v1807_v52, %v1574_v53  ;;  %v1557_v54 = vmul.f32 %v1806_v3, %v1546_v43 }
 0xe0b   :  { %1606 = vmatpush.msrb.mxu0 %v1557_v54 }
 0xe0c   :  { %1728 = vmatmul.msk.f32.vlgmr.msrb.gmra.mxu0 %vm458_vm6, %v1583_v0 }
 0xe0d   :  { %1661 = vmatpush.msra.mxu0 %v1580_v45 }
 0xe0f   :  { %1662 = vmatpush.msra.mxu0 %v1579_v57 }
 0xe10   :  { %v1568_v61 = vpop.permute.xlu0 %1567  ;;  %v1570_v56 = vpop.permute.xlu1 %1569 }
 0xe11   :  { %v1578_v58 = vmul.f32 %v1807_v52, %v1570_v56  ;;  %v1577_v20 = vmul.f32 %v1807_v52, %v1568_v61 }
 0xe13   :  { %1663 = vmatpush.msra.mxu0 %v1578_v58 }
 0xe14   :  { %1729 = vmatmul.msk.f32.gmra.mxu0 %vm458_vm6, %v1584_v27 }
 0xe15   :  { %1664 = vmatpush.msra.mxu0 %v1577_v20 }
 0xe17   :  { %1665 = vmatpush.msra.mxu0 %v1576_v28 }
 0xe18   :  { %v1564_v60 = vpop.permute.xlu1 %1563 }
 0xe19   :  { %v1575_v63 = vmul.f32 %v1807_v52, %v1564_v60 }
 0xe1b   :  { %1666 = vmatpush.msra.mxu0 %v1575_v63  ;;  %v1637_v4 = vpop.f32.mrf.mxu2 }
 0xe1c   :  { %1732 = vmatmul.msk.f32.vlgmr.msra.gmra.mxu0 %vm458_vm6, %v1643_v37 }
 0xe23   :  { %v1640_v12 = vpop.f32.mrf.mxu2 }
 0xe24   :  { %1733 = vmatmul.msk.f32.gmra.mxu0 %vm458_vm6, %v1644_v1 }
 0xe89   :  { %v1608_v2 = vpop.f32.mrf.mxu0 }
 0xe8a   :  { %v1638_v5 = vadd.f32 %v1637_v4, %v1608_v2 }
 0xe91   :  { %v1611_v26 = vpop.f32.mrf.mxu0 }
 0xe92   :  { %v1641_v13 = vadd.f32 %v1640_v12, %v1611_v26 }
 0xe99   :  { %v1668_v8 = vpop.f32.mrf.mxu0 }
 0xe9a   :  { %v1674_v10 = vadd.f32 %v1668_v8, %v1638_v5 }
 0xe9c   :  { %v1676_v11 = vmul.f32 %v2359_v6, %v1674_v10 }
 0xe9e   :  { %1678 = vst [vmem:[#allocation2 + $0x28] sm:$0xff] %v1676_v11 }
 0xea1   :  { %v1671_v14 = vpop.f32.mrf.mxu0 }
 0xea2   :  { %v1675_v7 = vadd.f32 %v1671_v14, %v1641_v13 }
 0xea4   :  { %v1677_v15 = vmul.f32 %v2359_v6, %v1675_v7 }
 0xea6   :  { %1679 = vst [vmem:[#allocation2 + $0x30] sm:$0xff] %v1677_v15 }
 0xea7   :  { %1692 = dma.vmem_to_hbm [thread:$0]  %s1685_s13, 896, %s1687_s14, [#allocation3], %s1838_s27, %s1838_s27, %s1839_s8  }
 0xea8   :  { %1832 = dma.done.wait [#allocation3], 896  }
 0xea9   :  { %1833 = vsyncadd [#allocation3], 4294966400 }
 0xeaa   :  { %1697 = vsyncpa [#allocation3], 1 }

</bundles_post_ra>
